<compile_context>
chip_gen: v7x
topology: tpu7x:2x2x1
jax: 0.10.0
libtpu: 0.0.40
codegen_flags: <defaults>
</compile_context>

<pallas_src>
import jax
import jax.numpy as jnp
import numpy as np
from jax.experimental import pallas as pl
from jax.experimental.pallas import tpu as pltpu

LANES = 128

_VMEM_SPEC = pl.BlockSpec(memory_space=pltpu.MemorySpace.VMEM)


def _round_up(v, m):
    return (v + m - 1) // m * m


# ----------------------------------------------------------------------------
# Pallas kernels
# ----------------------------------------------------------------------------
def _conv_relu_pool_kernel(p_ref, w_ref, b_ref, o_ref):
    """Fused im2col-conv + bias + ReLU + 2x2/stride-2 maxpool, as ONE matmul.

    p_ref: (4*Mp, Kp) bf16 -- im2col patches, tap-major: rows [t*Mp, (t+1)*Mp)
                              hold pool-window tap t for all Mp pooled positions.
    w_ref: (Kp, Cp)  bf16  -- conv weights as a matrix (Cp = 128-padded out ch).
    b_ref: (1, Cp)   f32
    o_ref: (Mp, Cp)  bf16  -- pooled, activated output (lane dense).
    """
    mp = o_ref.shape[0]
    # Single long MXU stream: RHS (weights) is pushed once for all 4 pool taps.
    y = jnp.dot(p_ref[...], w_ref[...], preferred_element_type=jnp.float32)
    # maxpool(relu(conv + b)) == relu(max(conv taps) + b)  (per-channel bias b).
    y = jnp.maximum(jnp.maximum(y[0:mp], y[mp:2 * mp]),
                    jnp.maximum(y[2 * mp:3 * mp], y[3 * mp:4 * mp]))
    o_ref[...] = jnp.maximum(y + b_ref[...], 0.0).astype(o_ref.dtype)


def _fc_stack_kernel(x_ref, w1_ref, b1_ref, w2_ref, b2_ref, w3_ref, b3_ref,
                     o_ref):
    """fc1+ReLU -> fc2+ReLU -> fc3; all weights VMEM resident, bf16 MXU/f32 acc."""
    h = jnp.dot(x_ref[...], w1_ref[...], preferred_element_type=jnp.float32)
    h = jnp.maximum(h + b1_ref[...], 0.0)
    h = jnp.dot(h.astype(w2_ref.dtype), w2_ref[...],
                preferred_element_type=jnp.float32)
    h = jnp.maximum(h + b2_ref[...], 0.0)
    h = jnp.dot(h.astype(w3_ref.dtype), w3_ref[...],
                preferred_element_type=jnp.float32)
    o_ref[...] = (h + b3_ref[...]).astype(o_ref.dtype)


def conv_relu_pool(patches, w, b, m_pad):
    rows, kp = patches.shape
    assert rows == 4 * m_pad and kp == w.shape[0] and w.shape[1] % LANES == 0
    return pl.pallas_call(
        _conv_relu_pool_kernel,
        out_shape=jax.ShapeDtypeStruct((m_pad, w.shape[1]), jnp.bfloat16),
        in_specs=[_VMEM_SPEC] * 3,
        out_specs=_VMEM_SPEC,
    )(patches, w, b)


def fc_stack(x, w1, b1, w2, b2, w3, b3):
    return pl.pallas_call(
        _fc_stack_kernel,
        out_shape=jax.ShapeDtypeStruct((x.shape[0], w3.shape[1]), jnp.float32),
        in_specs=[_VMEM_SPEC] * 7,
        out_specs=_VMEM_SPEC,
    )(x, w1, b1, w2, b2, w3, b3)


# ----------------------------------------------------------------------------
# Plain-JAX glue (patch / pool-tap extraction, one-time weight packing)
# ----------------------------------------------------------------------------
def _im2col_nhwc(x, k):
    """x: (N,H,W,C) -> (N, H-k+1, W-k+1, C*k*k).

    Column order ci*k*k + kh*k + kw (matches PyTorch Conv2d weight flatten)."""
    n, h, w, c = x.shape
    ho, wo = h - k + 1, w - k + 1
    cols = [x[:, kh:kh + ho, kw:kw + wo, :] for kh in range(k) for kw in range(k)]
    pat = jnp.stack(cols, axis=-1)                      # (N, ho, wo, C, k*k)
    return pat.reshape(n, ho, wo, c * k * k)


def _pool_tap_fold(pat, m_pad, k_pad):
    """pat: (N, H', W', K) conv-output patches (H', W' even).

    Returns (4*m_pad, k_pad) bf16, tap-major: rows [t*m_pad, (t+1)*m_pad) hold
    2x2-pool tap t for all N*(H'/2)*(W'/2) pooled positions, (n, ho, wo) order.
    """
    n, hp, wp, k = pat.shape
    m = n * (hp // 2) * (wp // 2)
    taps = []
    for th in range(2):
        for tw in range(2):
            t = pat[:, th::2, tw::2, :].reshape(m, k)
            taps.append(jnp.pad(t, ((0, m_pad - m), (0, k_pad - k))))
    return jnp.concatenate(taps, axis=0).astype(jnp.bfloat16)


def prepare_params(params):
    """One-time packing of PyTorch-layout weights into matmul-ready, 128-padded
    bf16 matrices (+ f32 biases).  Done once, outside the jitted forward."""
    (w1, b1, w2, b2, fw1, fb1, fw2, fb2, fw3, fb3) = params

    def pack_w(mat):
        k, n = mat.shape
        kp, np_ = _round_up(k, LANES), _round_up(n, LANES)
        return jnp.pad(mat, ((0, kp - k), (0, np_ - n))).astype(jnp.bfloat16)

    def pack_b(b):
        np_ = _round_up(b.shape[0], LANES)
        return jnp.pad(b, (0, np_ - b.shape[0])).reshape(1, np_).astype(jnp.float32)

    def conv_w(w):                     # PyTorch (O, I, kH, kW) -> (I*kH*kW, O)
        o, i, kh, kw = w.shape
        return jnp.transpose(w, (1, 2, 3, 0)).reshape(i * kh * kw, o)

    # fc1 rows: PyTorch NCHW flatten (c*25 + p) -> NHWC flatten (p*16 + c), so
    # the kernel-side flatten needs NO transpose of the conv2 activations.
    perm = np.array([c * 25 + p for p in range(25) for c in range(16)])
    fw1_nhwc = fw1.T[perm]

    return dict(
        cw1=pack_w(conv_w(w1)), cb1=pack_b(b1),
        cw2=pack_w(conv_w(w2)), cb2=pack_b(b2),
        fw1=pack_w(fw1_nhwc), fb1=pack_b(fb1),
        fw2=pack_w(fw2.T), fb2=pack_b(fb2),
        fw3=pack_w(fw3.T), fb3=pack_b(fb3),
    )


# ----------------------------------------------------------------------------
# LeNet forward (Pallas) and pure-XLA reference
# ----------------------------------------------------------------------------
@jax.jit
def lenet_forward(x, pp):
    """x: (N, 1, 28, 28) float32 (PyTorch NCHW).  Returns (N, 10) f32 logits."""
    n = x.shape[0]

    # NCHW -> NHWC is a pure reshape for C == 1 (no transpose / data movement).
    xh = jnp.pad(x.reshape(n, 28, 28, 1), ((0, 0), (2, 2), (2, 2), (0, 0)))

    # conv1: Conv2d(1, 6, 5, padding=2) + ReLU + MaxPool2d(2, 2)
    m1 = n * 14 * 14
    m1p = _round_up(m1, 16)                          # bf16 sublane-tile aligned
    p1 = _pool_tap_fold(_im2col_nhwc(xh, 5), m1p, pp["cw1"].shape[0])
    y1 = conv_relu_pool(p1, pp["cw1"], pp["cb1"], m1p)        # (m1p, 128) bf16
    y1 = y1[:m1, :6].reshape(n, 14, 14, 6)                    # NHWC, no transpose

    # conv2: Conv2d(6, 16, 5) + ReLU + MaxPool2d(2, 2)
    m2 = n * 5 * 5
    m2p = _round_up(m2, 16)
    p2 = _pool_tap_fold(_im2col_nhwc(y1, 5), m2p, pp["cw2"].shape[0])
    y2 = conv_relu_pool(p2, pp["cw2"], pp["cb2"], m2p)        # (m2p, 128) bf16

    # Flatten in NHWC order (fw1 rows were pre-permuted to match), pad M to 8.
    flat = y2[:m2, :16].reshape(n, 16 * 5 * 5)
    nb = _round_up(n, 8)
    flat = jnp.pad(flat, ((0, nb - n), (0, pp["fw1"].shape[0] - 16 * 5 * 5)))

    logits = fc_stack(flat, pp["fw1"], pp["fb1"], pp["fw2"], pp["fb2"],
                      pp["fw3"], pp["fb3"])
    return logits[:n, :10]


@jax.jit
def reference_forward(x, params):
    """Pure-XLA reference with the SAME numerics as the kernels (bf16 matmul/conv
    inputs, f32 accumulation) so the comparison tolerance stays tight."""
    (w1, b1, w2, b2, fw1, fb1, fw2, fb2, fw3, fb3) = params
    bf16, f32 = jnp.bfloat16, jnp.float32

    y = jax.lax.conv_general_dilated(
        x.astype(bf16), w1.astype(bf16), (1, 1), ((2, 2), (2, 2)),
        dimension_numbers=("NCHW", "OIHW", "NCHW"), preferred_element_type=f32)
    y = jax.nn.relu(y + b1[None, :, None, None])
    y = jax.lax.reduce_window(y, -jnp.inf, jax.lax.max,
                              (1, 1, 2, 2), (1, 1, 2, 2), "VALID")
    y = jax.lax.conv_general_dilated(
        y.astype(bf16), w2.astype(bf16), (1, 1), ((0, 0), (0, 0)),
        dimension_numbers=("NCHW", "OIHW", "NCHW"), preferred_element_type=f32)
    y = jax.nn.relu(y + b2[None, :, None, None])
    y = jax.lax.reduce_window(y, -jnp.inf, jax.lax.max,
                              (1, 1, 2, 2), (1, 1, 2, 2), "VALID")
    y = y.reshape(y.shape[0], -1)
    y = jax.nn.relu(jnp.dot(y.astype(bf16), fw1.T.astype(bf16),
                            preferred_element_type=f32) + fb1)
    y = jax.nn.relu(jnp.dot(y.astype(bf16), fw2.T.astype(bf16),
                            preferred_element_type=f32) + fb2)
    return jnp.dot(y.astype(bf16), fw3.T.astype(bf16),
                   preferred_element_type=f32) + fb3


def init_params(key):
    ks = jax.random.split(key, 10)

    def n(k, shape, scale):
        return scale * jax.random.normal(k, shape, jnp.float32)

    w1 = n(ks[0], (6, 1, 5, 5), 0.2)
    b1 = n(ks[1], (6,), 0.1)
    w2 = n(ks[2], (16, 6, 5, 5), 0.1)
    b2 = n(ks[3], (16,), 0.1)
    fw1 = n(ks[4], (120, 400), 0.05)
    fb1 = n(ks[5], (120,), 0.05)
    fw2 = n(ks[6], (84, 120), 0.05)
    fb2 = n(ks[7], (84,), 0.05)
    fw3 = n(ks[8], (10, 84), 0.05)
    fb3 = n(ks[9], (10,), 0.05)
    return (w1, b1, w2, b2, fw1, fb1, fw2, fb2, fw3, fb3)


if __name__ == "__main__":
    root = jax.random.PRNGKey(0)
    pkey, xkey = jax.random.split(root)
    params = init_params(pkey)
    packed = prepare_params(params)   # one-time weight packing (outside the jit)

    # LeNet's fc1 (16*5*5) pins the input to 1 channel x 28x28; batch kept small.
    x = jax.random.normal(xkey, (2, 1, 28, 28), jnp.float32)

    out = jax.block_until_ready(lenet_forward(x, packed))
    ref = jax.block_until_ready(reference_forward(x, params))

    assert out.shape == (2, 10), out.shape
    # Both paths use bf16 MXU inputs with f32 accumulation and round to bf16 at
    # the same layer boundaries; residual differences come only from dot
    # accumulation order.
    err = float(np.max(np.abs(np.asarray(out) - np.asarray(ref))))
    assert np.allclose(np.asarray(out), np.asarray(ref), rtol=1e-2, atol=1e-2), err
    print("KERNEL_OK")
</pallas_src>

<mosaic_0001>
module attributes {stable_mosaic.version = 11 : i64} {
  func.func @_conv_relu_pool_kernel(%arg0: memref<1600x128xbf16, #tpu.memory_space<vmem>>, %arg1: memref<128x128xbf16, #tpu.memory_space<vmem>>, %arg2: memref<1x128xf32, #tpu.memory_space<vmem>>, %arg3: memref<400x128xbf16, #tpu.memory_space<vmem>>) attributes {dimension_semantics = [], scalar_prefetch = 0 : i64, scratch_operands = 0 : i64, tpu.core_type = #tpu.core_type<tc>} {
    %c0 = arith.constant 0 : index
    %c0_0 = arith.constant 0 : index
    %0 = vector.load %arg0[%c0, %c0_0] : memref<1600x128xbf16, #tpu.memory_space<vmem>>, vector<1600x128xbf16>
    %c0_1 = arith.constant 0 : index
    %c0_2 = arith.constant 0 : index
    %1 = vector.load %arg1[%c0_1, %c0_2] : memref<128x128xbf16, #tpu.memory_space<vmem>>, vector<128x128xbf16>
    %cst = arith.constant dense<0.000000e+00> : vector<1600x128xf32>
    %2 = tpu.matmul %0, %1, %cst {dimension_numbers = #tpu.dot_dimension_numbers<[1], [0], [0], [1], [0, 0, 1, 1], [], []>} : vector<1600x128xbf16>, vector<128x128xbf16>, vector<1600x128xf32> -> vector<1600x128xf32>
    %3 = vector.extract_strided_slice %2 {offsets = [0, 0], sizes = [400, 128], strides = [1, 1]} : vector<1600x128xf32> to vector<400x128xf32>
    %4 = vector.extract_strided_slice %2 {offsets = [400, 0], sizes = [400, 128], strides = [1, 1]} : vector<1600x128xf32> to vector<400x128xf32>
    %5 = arith.maximumf %3, %4 : vector<400x128xf32>
    %6 = vector.extract_strided_slice %2 {offsets = [800, 0], sizes = [400, 128], strides = [1, 1]} : vector<1600x128xf32> to vector<400x128xf32>
    %7 = vector.extract_strided_slice %2 {offsets = [1200, 0], sizes = [400, 128], strides = [1, 1]} : vector<1600x128xf32> to vector<400x128xf32>
    %8 = arith.maximumf %6, %7 : vector<400x128xf32>
    %9 = arith.maximumf %5, %8 : vector<400x128xf32>
    %c0_3 = arith.constant 0 : index
    %c0_4 = arith.constant 0 : index
    %10 = vector.load %arg2[%c0_3, %c0_4] : memref<1x128xf32, #tpu.memory_space<vmem>>, vector<1x128xf32>
    %11 = vector.broadcast %10 : vector<1x128xf32> to vector<400x128xf32>
    %12 = arith.addf %9, %11 : vector<400x128xf32>
    %cst_5 = arith.constant 0.000000e+00 : f32
    %13 = vector.broadcast %cst_5 : f32 to vector<400x128xf32>
    %14 = arith.maximumf %12, %13 : vector<400x128xf32>
    %15 = arith.truncf %14 : vector<400x128xf32> to vector<400x128xbf16>
    %c0_6 = arith.constant 0 : index
    %c0_7 = arith.constant 0 : index
    %16 = vector.load %arg3[%c0_6, %c0_7] : memref<400x128xbf16, #tpu.memory_space<vmem>>, vector<400x128xbf16>
    tpu.vector_store %arg3[%c0_6, %c0_7], %15 {strides = array<i32>} : memref<400x128xbf16, #tpu.memory_space<vmem>>, vector<400x128xbf16>,
    return
  }
}

module attributes {stable_mosaic.version = 11 : i64} {
  func.func @_conv_relu_pool_kernel(%arg0: memref<256x256xbf16, #tpu.memory_space<vmem>>, %arg1: memref<256x128xbf16, #tpu.memory_space<vmem>>, %arg2: memref<1x128xf32, #tpu.memory_space<vmem>>, %arg3: memref<64x128xbf16, #tpu.memory_space<vmem>>) attributes {dimension_semantics = [], scalar_prefetch = 0 : i64, scratch_operands = 0 : i64, tpu.core_type = #tpu.core_type<tc>} {
    %c0 = arith.constant 0 : index
    %c0_0 = arith.constant 0 : index
    %0 = vector.load %arg0[%c0, %c0_0] : memref<256x256xbf16, #tpu.memory_space<vmem>>, vector<256x256xbf16>
    %c0_1 = arith.constant 0 : index
    %c0_2 = arith.constant 0 : index
    %1 = vector.load %arg1[%c0_1, %c0_2] : memref<256x128xbf16, #tpu.memory_space<vmem>>, vector<256x128xbf16>
    %cst = arith.constant dense<0.000000e+00> : vector<256x128xf32>
    %2 = tpu.matmul %0, %1, %cst {dimension_numbers = #tpu.dot_dimension_numbers<[1], [0], [0], [1], [0, 0, 1, 1], [], []>} : vector<256x256xbf16>, vector<256x128xbf16>, vector<256x128xf32> -> vector<256x128xf32>
    %3 = vector.extract_strided_slice %2 {offsets = [0, 0], sizes = [64, 128], strides = [1, 1]} : vector<256x128xf32> to vector<64x128xf32>
    %4 = vector.extract_strided_slice %2 {offsets = [64, 0], sizes = [64, 128], strides = [1, 1]} : vector<256x128xf32> to vector<64x128xf32>
    %5 = arith.maximumf %3, %4 : vector<64x128xf32>
    %6 = vector.extract_strided_slice %2 {offsets = [128, 0], sizes = [64, 128], strides = [1, 1]} : vector<256x128xf32> to vector<64x128xf32>
    %7 = vector.extract_strided_slice %2 {offsets = [192, 0], sizes = [64, 128], strides = [1, 1]} : vector<256x128xf32> to vector<64x128xf32>
    %8 = arith.maximumf %6, %7 : vector<64x128xf32>
    %9 = arith.maximumf %5, %8 : vector<64x128xf32>
    %c0_3 = arith.constant 0 : index
    %c0_4 = arith.constant 0 : index
    %10 = vector.load %arg2[%c0_3, %c0_4] : memref<1x128xf32, #tpu.memory_space<vmem>>, vector<1x128xf32>
    %11 = vector.broadcast %10 : vector<1x128xf32> to vector<64x128xf32>
    %12 = arith.addf %9, %11 : vector<64x128xf32>
    %cst_5 = arith.constant 0.000000e+00 : f32
    %13 = vector.broadcast %cst_5 : f32 to vector<64x128xf32>
    %14 = arith.maximumf %12, %13 : vector<64x128xf32>
    %15 = arith.truncf %14 : vector<64x128xf32> to vector<64x128xbf16>
    %c0_6 = arith.constant 0 : index
    %c0_7 = arith.constant 0 : index
    %16 = vector.load %arg3[%c0_6, %c0_7] : memref<64x128xbf16, #tpu.memory_space<vmem>>, vector<64x128xbf16>
    tpu.vector_store %arg3[%c0_6, %c0_7], %15 {strides = array<i32>} : memref<64x128xbf16, #tpu.memory_space<vmem>>, vector<64x128xbf16>,
    return
  }
}

module attributes {stable_mosaic.version = 11 : i64} {
  func.func @_fc_stack_kernel(%arg0: memref<8x512xbf16, #tpu.memory_space<vmem>>, %arg1: memref<512x128xbf16, #tpu.memory_space<vmem>>, %arg2: memref<1x128xf32, #tpu.memory_space<vmem>>, %arg3: memref<128x128xbf16, #tpu.memory_space<vmem>>, %arg4: memref<1x128xf32, #tpu.memory_space<vmem>>, %arg5: memref<128x128xbf16, #tpu.memory_space<vmem>>, %arg6: memref<1x128xf32, #tpu.memory_space<vmem>>, %arg7: memref<8x128xf32, #tpu.memory_space<vmem>>) attributes {dimension_semantics = [], scalar_prefetch = 0 : i64, scratch_operands = 0 : i64, tpu.core_type = #tpu.core_type<tc>} {
    %c0 = arith.constant 0 : index
    %c0_0 = arith.constant 0 : index
    %0 = vector.load %arg0[%c0, %c0_0] : memref<8x512xbf16, #tpu.memory_space<vmem>>, vector<8x512xbf16>
    %c0_1 = arith.constant 0 : index
    %c0_2 = arith.constant 0 : index
    %1 = vector.load %arg1[%c0_1, %c0_2] : memref<512x128xbf16, #tpu.memory_space<vmem>>, vector<512x128xbf16>
    %cst = arith.constant dense<0.000000e+00> : vector<8x128xf32>
    %2 = tpu.matmul %0, %1, %cst {dimension_numbers = #tpu.dot_dimension_numbers<[1], [0], [0], [1], [0, 0, 1, 1], [], []>} : vector<8x512xbf16>, vector<512x128xbf16>, vector<8x128xf32> -> vector<8x128xf32>
    %c0_3 = arith.constant 0 : index
    %c0_4 = arith.constant 0 : index
    %3 = vector.load %arg2[%c0_3, %c0_4] : memref<1x128xf32, #tpu.memory_space<vmem>>, vector<1x128xf32>
    %4 = vector.broadcast %3 : vector<1x128xf32> to vector<8x128xf32>
    %5 = arith.addf %2, %4 : vector<8x128xf32>
    %cst_5 = arith.constant 0.000000e+00 : f32
    %6 = vector.broadcast %cst_5 : f32 to vector<8x128xf32>
    %7 = arith.maximumf %5, %6 : vector<8x128xf32>
    %8 = arith.truncf %7 : vector<8x128xf32> to vector<8x128xbf16>
    %c0_6 = arith.constant 0 : index
    %c0_7 = arith.constant 0 : index
    %9 = vector.load %arg3[%c0_6, %c0_7] : memref<128x128xbf16, #tpu.memory_space<vmem>>, vector<128x128xbf16>
    %cst_8 = arith.constant dense<0.000000e+00> : vector<8x128xf32>
    %10 = tpu.matmul %8, %9, %cst_8 {dimension_numbers = #tpu.dot_dimension_numbers<[1], [0], [0], [1], [0, 0, 1, 1], [], []>} : vector<8x128xbf16>, vector<128x128xbf16>, vector<8x128xf32> -> vector<8x128xf32>
    %c0_9 = arith.constant 0 : index
    %c0_10 = arith.constant 0 : index
    %11 = vector.load %arg4[%c0_9, %c0_10] : memref<1x128xf32, #tpu.memory_space<vmem>>, vector<1x128xf32>
    %12 = vector.broadcast %11 : vector<1x128xf32> to vector<8x128xf32>
    %13 = arith.addf %10, %12 : vector<8x128xf32>
    %cst_11 = arith.constant 0.000000e+00 : f32
    %14 = vector.broadcast %cst_11 : f32 to vector<8x128xf32>
    %15 = arith.maximumf %13, %14 : vector<8x128xf32>
    %16 = arith.truncf %15 : vector<8x128xf32> to vector<8x128xbf16>
    %c0_12 = arith.constant 0 : index
    %c0_13 = arith.constant 0 : index
    %17 = vector.load %arg5[%c0_12, %c0_13] : memref<128x128xbf16, #tpu.memory_space<vmem>>, vector<128x128xbf16>
    %cst_14 = arith.constant dense<0.000000e+00> : vector<8x128xf32>
    %18 = tpu.matmul %16, %17, %cst_14 {dimension_numbers = #tpu.dot_dimension_numbers<[1], [0], [0], [1], [0, 0, 1, 1], [], []>} : vector<8x128xbf16>, vector<128x128xbf16>, vector<8x128xf32> -> vector<8x128xf32>
    %c0_15 = arith.constant 0 : index
    %c0_16 = arith.constant 0 : index
    %19 = vector.load %arg6[%c0_15, %c0_16] : memref<1x128xf32, #tpu.memory_space<vmem>>, vector<1x128xf32>
    %20 = vector.broadcast %19 : vector<1x128xf32> to vector<8x128xf32>
    %21 = arith.addf %18, %20 : vector<8x128xf32>
    %c0_17 = arith.constant 0 : index
    %c0_18 = arith.constant 0 : index
    %22 = vector.load %arg7[%c0_17, %c0_18] : memref<8x128xf32, #tpu.memory_space<vmem>>, vector<8x128xf32>
    tpu.vector_store %arg7[%c0_17, %c0_18], %21 {strides = array<i32>} : memref<8x128xf32, #tpu.memory_space<vmem>>, vector<8x128xf32>,
    return
  }
}

</mosaic_0001>

<bundles_post_ra>
// kernel: lenet_forward.3
= control target key start
LH: loop header
LB: loop body
LE: loop exit
PB: predicated region body
PF: predicated region fallthrough
CT: control target
= control target key end

     0   :  { %s3803_s1 = inlined_call_operand.vmem [shape: bf16[128,128], index: 1, kind: input, shape index: {}]   ;;  %s3804_s0 = inlined_call_operand.vmem [shape: bf16[1600,128], index: 0, kind: input, shape index: {}]   ;;  %s3805_s2 = inlined_call_operand.vmem [shape: f32[1,128], index: 2, kind: input, shape index: {}]   ;;  %s3806_s3 = inlined_call_operand.vmem [shape: bf16[400,128], index: 3, kind: output, shape index: {}]  }
   0x1   :  { %v2921_v0 = vld [vmem:[%s3803_s1] sm:$0xff]   ;;  %v2922_v1 = vld [vmem:[%s3803_s1 + $0x8] sm:$0xff]   ;;  %v2923_v2 = vld [vmem:[%s3803_s1 + $0x10] sm:$0xff]  }
   0x2   :  { %2689 = vmatprep.subr.bf16.mxu0 %v2921_v0  ;;  %2905 = vmatprep.subr.bf16.mxu1 %v2921_v0  ;;  %v2924_v3 = vld [vmem:[%s3803_s1 + $0x18] sm:$0xff]   ;;  %v2929_v4 = vld [vmem:[%s3804_s0] sm:$0xff]   ;;  %v2930_v5 = vld [vmem:[%s3804_s0 + $0x190] sm:$0xff]  }
   0x3   :  { %2690 = vmatpush3.bf16.msra.mxu0 %v2921_v0  ;;  %2913 = vmatpush3.bf16.msra.mxu1 %v2921_v0  ;;  %v2925_v6 = vld [vmem:[%s3803_s1 + $0x20] sm:$0xff]   ;;  %v2926_v7 = vld [vmem:[%s3803_s1 + $0x28] sm:$0xff]   ;;  %v2927_v8 = vld [vmem:[%s3803_s1 + $0x30] sm:$0xff]  }
   0x4   :  { %2691 = vmatprep.subr.bf16.mxu0 %v2922_v1  ;;  %2906 = vmatprep.subr.bf16.mxu1 %v2922_v1  ;;  %v2928_v9 = vld [vmem:[%s3803_s1 + $0x38] sm:$0xff]   ;;  %v2931_v10 = vld [vmem:[%s3804_s0 + $0x8] sm:$0xff]   ;;  %v2933_v12 = vld [vmem:[%s3804_s0 + $0x10] sm:$0xff]  }
   0x5   :  { %2705 = vmatprep.mubr.bf16.mxu0 %v2929_v4  ;;  %2805 = vmatprep.mubr.bf16.mxu1 %v2930_v5  ;;  %v2932_v11 = vld [vmem:[%s3804_s0 + $0x198] sm:$0xff]   ;;  %v2934_v13 = vld [vmem:[%s3804_s0 + $0x1a0] sm:$0xff]   ;;  %v2936_v15 = vld [vmem:[%s3804_s0 + $0x1a8] sm:$0xff]  }
   0x6   :  { %v2935_v14 = vld [vmem:[%s3804_s0 + $0x18] sm:$0xff]   ;;  %v2937_v16 = vld [vmem:[%s3804_s0 + $0x20] sm:$0xff]   ;;  %v2938_v17 = vld [vmem:[%s3804_s0 + $0x1b0] sm:$0xff]  }
   0x7   :  { %2692 = vmatpush3.bf16.msra.mxu0 %v2922_v1  ;;  %2914 = vmatpush3.bf16.msra.mxu1 %v2922_v1  ;;  %v2939_v18 = vld [vmem:[%s3804_s0 + $0x28] sm:$0xff]   ;;  %v2940_v19 = vld [vmem:[%s3804_s0 + $0x1b8] sm:$0xff]   ;;  %v2941_v20 = vld [vmem:[%s3804_s0 + $0x30] sm:$0xff]  }
   0x8   :  { %2693 = vmatprep.subr.bf16.mxu0 %v2923_v2  ;;  %2907 = vmatprep.subr.bf16.mxu1 %v2923_v2  ;;  %v2942_v21 = vld [vmem:[%s3804_s0 + $0x1c0] sm:$0xff]   ;;  %v2943_v22 = vld [vmem:[%s3804_s0 + $0x38] sm:$0xff]   ;;  %v2944_v23 = vld [vmem:[%s3804_s0 + $0x1c8] sm:$0xff]  }
   0x9   :  { %v2945_v24 = vld [vmem:[%s3804_s0 + $0x40] sm:$0xff]   ;;  %v2946_v25 = vld [vmem:[%s3804_s0 + $0x1d0] sm:$0xff]   ;;  %v2947_v26 = vld [vmem:[%s3804_s0 + $0x48] sm:$0xff]  }
   0xa   :  { %v2948_v27 = vld [vmem:[%s3804_s0 + $0x1d8] sm:$0xff]   ;;  %v2949_v28 = vld [vmem:[%s3804_s0 + $0x50] sm:$0xff]   ;;  %v2950_v29 = vld [vmem:[%s3804_s0 + $0x1e0] sm:$0xff]  }
   0xb   :  { %2694 = vmatpush3.bf16.msra.mxu0 %v2923_v2  ;;  %2915 = vmatpush3.bf16.msra.mxu1 %v2923_v2  ;;  %v2951_v30 = vld [vmem:[%s3804_s0 + $0x58] sm:$0xff]   ;;  %v2952_v31 = vld [vmem:[%s3804_s0 + $0x1e8] sm:$0xff]   ;;  %v2953_v32 = vld [vmem:[%s3804_s0 + $0x60] sm:$0xff]  }
   0xc   :  { %2695 = vmatprep.subr.bf16.mxu0 %v2924_v3  ;;  %2908 = vmatprep.subr.bf16.mxu1 %v2924_v3  ;;  %v2954_v33 = vld [vmem:[%s3804_s0 + $0x1f0] sm:$0xff]   ;;  %v2955_v34 = vld [vmem:[%s3804_s0 + $0x68] sm:$0xff]   ;;  %v2956_v35 = vld [vmem:[%s3804_s0 + $0x1f8] sm:$0xff]  }
   0xd   :  { %v2957_v36 = vld [vmem:[%s3804_s0 + $0x70] sm:$0xff]   ;;  %v2958_v37 = vld [vmem:[%s3804_s0 + $0x200] sm:$0xff]   ;;  %v2959_v38 = vld [vmem:[%s3804_s0 + $0x78] sm:$0xff]  }
   0xe   :  { %v2960_v39 = vld [vmem:[%s3804_s0 + $0x208] sm:$0xff]   ;;  %v2961_v40 = vld [vmem:[%s3804_s0 + $0x80] sm:$0xff]   ;;  %v2962_v41 = vld [vmem:[%s3804_s0 + $0x210] sm:$0xff]  }
   0xf   :  { %2696 = vmatpush3.bf16.msra.mxu0 %v2924_v3  ;;  %2916 = vmatpush3.bf16.msra.mxu1 %v2924_v3  ;;  %v2963_v42 = vld [vmem:[%s3804_s0 + $0x88] sm:$0xff]   ;;  %v2964_v43 = vld [vmem:[%s3804_s0 + $0x218] sm:$0xff]   ;;  %v2965_v44 = vld [vmem:[%s3804_s0 + $0x90] sm:$0xff]  }
  0x10   :  { %2697 = vmatprep.subr.bf16.mxu0 %v2925_v6  ;;  %2909 = vmatprep.subr.bf16.mxu1 %v2925_v6  ;;  %v2966_v45 = vld [vmem:[%s3804_s0 + $0x220] sm:$0xff]   ;;  %v2967_v46 = vld [vmem:[%s3804_s0 + $0x98] sm:$0xff]   ;;  %v2968_v47 = vld [vmem:[%s3804_s0 + $0x228] sm:$0xff]  }
  0x11   :  { %v2969_v48 = vld [vmem:[%s3804_s0 + $0xa0] sm:$0xff]   ;;  %v2970_v49 = vld [vmem:[%s3804_s0 + $0x230] sm:$0xff]   ;;  %v2971_v50 = vld [vmem:[%s3804_s0 + $0xa8] sm:$0xff]  }
  0x12   :  { %v2972_v51 = vld [vmem:[%s3804_s0 + $0x238] sm:$0xff]   ;;  %v2973_v52 = vld [vmem:[%s3804_s0 + $0xb0] sm:$0xff]   ;;  %v2974_v53 = vld [vmem:[%s3804_s0 + $0x240] sm:$0xff]  }
  0x13   :  { %2698 = vmatpush3.bf16.msra.mxu0 %v2925_v6  ;;  %2917 = vmatpush3.bf16.msra.mxu1 %v2925_v6  ;;  %v2975_v54 = vld [vmem:[%s3804_s0 + $0xb8] sm:$0xff]   ;;  %v2976_v55 = vld [vmem:[%s3804_s0 + $0x248] sm:$0xff]   ;;  %v2977_v56 = vld [vmem:[%s3804_s0 + $0xc0] sm:$0xff]  }
  0x14   :  { %2699 = vmatprep.subr.bf16.mxu0 %v2926_v7  ;;  %2910 = vmatprep.subr.bf16.mxu1 %v2926_v7  ;;  %v2978_v57 = vld [vmem:[%s3804_s0 + $0x250] sm:$0xff]   ;;  %v2979_v58 = vld [vmem:[%s3804_s0 + $0xc8] sm:$0xff]   ;;  %v2980_v59 = vld [vmem:[%s3804_s0 + $0x258] sm:$0xff]  }
  0x15   :  { %v2981_v60 = vld [vmem:[%s3804_s0 + $0xd0] sm:$0xff]   ;;  %v2982_v61 = vld [vmem:[%s3804_s0 + $0x260] sm:$0xff]   ;;  %v2983_v62 = vld [vmem:[%s3804_s0 + $0xd8] sm:$0xff]  }
  0x16   :  { %v2984_v63 = vld [vmem:[%s3804_s0 + $0x268] sm:$0xff]   ;;  %v2985_v0 = vld [vmem:[%s3804_s0 + $0xe0] sm:$0xff]   ;;  %v2986_v1 = vld [vmem:[%s3804_s0 + $0x270] sm:$0xff]  }
  0x17   :  { %2700 = vmatpush3.bf16.msra.mxu0 %v2926_v7  ;;  %2918 = vmatpush3.bf16.msra.mxu1 %v2926_v7  ;;  %v2987_v2 = vld [vmem:[%s3804_s0 + $0xe8] sm:$0xff]   ;;  %v2988_v3 = vld [vmem:[%s3804_s0 + $0x278] sm:$0xff]   ;;  %v2989_v4 = vld [vmem:[%s3804_s0 + $0xf0] sm:$0xff]  }
  0x18   :  { %2701 = vmatprep.subr.bf16.mxu0 %v2927_v8  ;;  %2911 = vmatprep.subr.bf16.mxu1 %v2927_v8  ;;  %v2990_v5 = vld [vmem:[%s3804_s0 + $0x280] sm:$0xff]   ;;  %v2991_v6 = vld [vmem:[%s3804_s0 + $0xf8] sm:$0xff]   ;;  %v2992_v7 = vld [vmem:[%s3804_s0 + $0x288] sm:$0xff]  }
  0x1b   :  { %2702 = vmatpush3.bf16.msra.mxu0 %v2927_v8  ;;  %2919 = vmatpush3.bf16.msra.mxu1 %v2927_v8  ;;  %v2993_v8 = vld [vmem:[%s3804_s0 + $0x100] sm:$0xff]  }
  0x1c   :  { %2703 = vmatprep.subr.bf16.mxu0 %v2928_v9  ;;  %2912 = vmatprep.subr.bf16.mxu1 %v2928_v9 }
  0x1f   :  { %2704 = vmatpush3.bf16.msra.mxu0 %v2928_v9  ;;  %2920 = vmatpush3.bf16.msra.mxu1 %v2928_v9  ;;  %v2994_v9 = vld [vmem:[%s3804_s0 + $0x290] sm:$0xff]  }
  0x22   :  { %2706 = vmatmul.mubr.bf16.vlgmr.msra.gmra.mrb[0].mxu0 %v2931_v10  ;;  %2806 = vmatmul.mubr.bf16.vlgmr.msra.gmra.mrb[0].mxu1 %v2932_v11  ;;  %v2995_v10 = vld [vmem:[%s3804_s0 + $0x108] sm:$0xff]   ;;  %v2996_v11 = vld [vmem:[%s3804_s0 + $0x298] sm:$0xff]  }
  0x23   :  { %2709 = vmatprep.mubr.bf16.mxu0 %v2933_v12  ;;  %2809 = vmatprep.mubr.bf16.mxu1 %v2934_v13  ;;  %v2997_v12 = vld [vmem:[%s3804_s0 + $0x110] sm:$0xff]   ;;  %v2998_v13 = vld [vmem:[%s3804_s0 + $0x2a0] sm:$0xff]  }
  0x2a   :  { %2710 = vmatmul.mubr.bf16.gmra.mrb[4].mxu0 %v2935_v14  ;;  %2810 = vmatmul.mubr.bf16.gmra.mrb[4].mxu1 %v2936_v15  ;;  %v2999_v14 = vld [vmem:[%s3804_s0 + $0x118] sm:$0xff]   ;;  %v3000_v15 = vld [vmem:[%s3804_s0 + $0x2a8] sm:$0xff]  }
  0x2b   :  { %2713 = vmatprep.mubr.bf16.mxu0 %v2937_v16  ;;  %2813 = vmatprep.mubr.bf16.mxu1 %v2938_v17  ;;  %v3001_v16 = vld [vmem:[%s3804_s0 + $0x120] sm:$0xff]   ;;  %v3002_v17 = vld [vmem:[%s3804_s0 + $0x2b0] sm:$0xff]  }
  0x32   :  { %2714 = vmatmul.mubr.bf16.gmra.mrb[8].mxu0 %v2939_v18  ;;  %2814 = vmatmul.mubr.bf16.gmra.mrb[8].mxu1 %v2940_v19  ;;  %v3003_v18 = vld [vmem:[%s3804_s0 + $0x128] sm:$0xff]   ;;  %v3004_v19 = vld [vmem:[%s3804_s0 + $0x2b8] sm:$0xff]  }
  0x33   :  { %2717 = vmatprep.mubr.bf16.mxu0 %v2941_v20  ;;  %2817 = vmatprep.mubr.bf16.mxu1 %v2942_v21  ;;  %v3005_v20 = vld [vmem:[%s3804_s0 + $0x130] sm:$0xff]   ;;  %v3006_v21 = vld [vmem:[%s3804_s0 + $0x2c0] sm:$0xff]  }
  0x3a   :  { %2718 = vmatmul.mubr.bf16.gmra.mrb[12].mxu0 %v2943_v22  ;;  %2818 = vmatmul.mubr.bf16.gmra.mrb[12].mxu1 %v2944_v23  ;;  %v3007_v22 = vld [vmem:[%s3804_s0 + $0x138] sm:$0xff]   ;;  %v3008_v23 = vld [vmem:[%s3804_s0 + $0x2c8] sm:$0xff]  }
  0x3b   :  { %2721 = vmatprep.mubr.bf16.mxu0 %v2945_v24  ;;  %2821 = vmatprep.mubr.bf16.mxu1 %v2946_v25  ;;  %v3009_v24 = vld [vmem:[%s3804_s0 + $0x140] sm:$0xff]   ;;  %v3010_v25 = vld [vmem:[%s3804_s0 + $0x2d0] sm:$0xff]  }
  0x42   :  { %2722 = vmatmul.mubr.bf16.gmra.mrb[16].mxu0 %v2947_v26  ;;  %2822 = vmatmul.mubr.bf16.gmra.mrb[16].mxu1 %v2948_v27  ;;  %v3011_v26 = vld [vmem:[%s3804_s0 + $0x148] sm:$0xff]   ;;  %v3012_v27 = vld [vmem:[%s3804_s0 + $0x2d8] sm:$0xff]  }
  0x43   :  { %2725 = vmatprep.mubr.bf16.mxu0 %v2949_v28  ;;  %2825 = vmatprep.mubr.bf16.mxu1 %v2950_v29  ;;  %v3013_v28 = vld [vmem:[%s3804_s0 + $0x150] sm:$0xff]   ;;  %v3014_v29 = vld [vmem:[%s3804_s0 + $0x2e0] sm:$0xff]  }
  0x4a   :  { %2726 = vmatmul.mubr.bf16.gmra.mrb[20].mxu0 %v2951_v30  ;;  %2826 = vmatmul.mubr.bf16.gmra.mrb[20].mxu1 %v2952_v31  ;;  %v3015_v30 = vld [vmem:[%s3804_s0 + $0x158] sm:$0xff]   ;;  %v3016_v31 = vld [vmem:[%s3804_s0 + $0x2e8] sm:$0xff]  }
  0x4b   :  { %2729 = vmatprep.mubr.bf16.mxu0 %v2953_v32  ;;  %2829 = vmatprep.mubr.bf16.mxu1 %v2954_v33  ;;  %v3017_v32 = vld [vmem:[%s3804_s0 + $0x160] sm:$0xff]   ;;  %v3018_v33 = vld [vmem:[%s3804_s0 + $0x2f0] sm:$0xff]  }
  0x52   :  { %2730 = vmatmul.mubr.bf16.gmra.mrb[24].mxu0 %v2955_v34  ;;  %2830 = vmatmul.mubr.bf16.gmra.mrb[24].mxu1 %v2956_v35  ;;  %v3019_v34 = vld [vmem:[%s3804_s0 + $0x168] sm:$0xff]   ;;  %v3020_v35 = vld [vmem:[%s3804_s0 + $0x2f8] sm:$0xff]  }
  0x53   :  { %2733 = vmatprep.mubr.bf16.mxu0 %v2957_v36  ;;  %2833 = vmatprep.mubr.bf16.mxu1 %v2958_v37  ;;  %v3021_v36 = vld [vmem:[%s3804_s0 + $0x170] sm:$0xff]   ;;  %v3022_v37 = vld [vmem:[%s3804_s0 + $0x300] sm:$0xff]  }
  0x5a   :  { %2734 = vmatmul.mubr.bf16.gmra.mrb[28].mxu0 %v2959_v38  ;;  %2834 = vmatmul.mubr.bf16.gmra.mrb[28].mxu1 %v2960_v39  ;;  %v3023_v38 = vld [vmem:[%s3804_s0 + $0x178] sm:$0xff]   ;;  %v3024_v39 = vld [vmem:[%s3804_s0 + $0x308] sm:$0xff]  }
  0x5b   :  { %2737 = vmatprep.mubr.bf16.mxu0 %v2961_v40  ;;  %2837 = vmatprep.mubr.bf16.mxu1 %v2962_v41  ;;  %v3025_v40 = vld [vmem:[%s3804_s0 + $0x180] sm:$0xff]   ;;  %v3026_v41 = vld [vmem:[%s3804_s0 + $0x310] sm:$0xff]  }
  0x62   :  { %2738 = vmatmul.mubr.bf16.gmra.mrb[32].mxu0 %v2963_v42  ;;  %2838 = vmatmul.mubr.bf16.gmra.mrb[32].mxu1 %v2964_v43  ;;  %v3027_v42 = vld [vmem:[%s3804_s0 + $0x188] sm:$0xff]   ;;  %v3028_v43 = vld [vmem:[%s3804_s0 + $0x318] sm:$0xff]  }
  0x63   :  { %2741 = vmatprep.mubr.bf16.mxu0 %v2965_v44  ;;  %2841 = vmatprep.mubr.bf16.mxu1 %v2966_v45 }
  0x6a   :  { %2742 = vmatmul.mubr.bf16.gmra.mrb[36].mxu0 %v2967_v46  ;;  %2842 = vmatmul.mubr.bf16.gmra.mrb[36].mxu1 %v2968_v47 }
  0x6b   :  { %2745 = vmatprep.mubr.bf16.mxu0 %v2969_v48  ;;  %2845 = vmatprep.mubr.bf16.mxu1 %v2970_v49 }
  0x72   :  { %2746 = vmatmul.mubr.bf16.gmra.mrb[40].mxu0 %v2971_v50  ;;  %2846 = vmatmul.mubr.bf16.gmra.mrb[40].mxu1 %v2972_v51 }
  0x73   :  { %2749 = vmatprep.mubr.bf16.mxu0 %v2973_v52  ;;  %2849 = vmatprep.mubr.bf16.mxu1 %v2974_v53 }
  0x7a   :  { %2750 = vmatmul.mubr.bf16.gmra.mrb[44].mxu0 %v2975_v54  ;;  %2850 = vmatmul.mubr.bf16.gmra.mrb[44].mxu1 %v2976_v55 }
  0x7b   :  { %2753 = vmatprep.mubr.bf16.mxu0 %v2977_v56  ;;  %2853 = vmatprep.mubr.bf16.mxu1 %v2978_v57 }
  0x82   :  { %2754 = vmatmul.mubr.bf16.gmra.mrb[48].mxu0 %v2979_v58  ;;  %2854 = vmatmul.mubr.bf16.gmra.mrb[48].mxu1 %v2980_v59 }
  0x83   :  { %2757 = vmatprep.mubr.bf16.mxu0 %v2981_v60  ;;  %2857 = vmatprep.mubr.bf16.mxu1 %v2982_v61 }
  0x8a   :  { %2758 = vmatmul.mubr.bf16.gmra.mrb[52].mxu0 %v2983_v62  ;;  %2858 = vmatmul.mubr.bf16.gmra.mrb[52].mxu1 %v2984_v63 }
  0x8b   :  { %2761 = vmatprep.mubr.bf16.mxu0 %v2985_v0  ;;  %2861 = vmatprep.mubr.bf16.mxu1 %v2986_v1 }
  0x92   :  { %2762 = vmatmul.mubr.bf16.gmra.mrb[56].mxu0 %v2987_v2  ;;  %2862 = vmatmul.mubr.bf16.gmra.mrb[56].mxu1 %v2988_v3 }
  0x93   :  { %2765 = vmatprep.mubr.bf16.mxu0 %v2989_v4  ;;  %2865 = vmatprep.mubr.bf16.mxu1 %v2990_v5 }
  0x9a   :  { %2766 = vmatmul.mubr.bf16.gmra.mrb[60].mxu0 %v2991_v6  ;;  %2866 = vmatmul.mubr.bf16.gmra.mrb[60].mxu1 %v2992_v7 }
  0x9b   :  { %2769 = vmatprep.mubr.bf16.mxu0 %v2993_v8  ;;  %2869 = vmatprep.mubr.bf16.mxu1 %v2994_v9 }
  0xa2   :  { %2770 = vmatmul.mubr.bf16.gmra.mrb[64].mxu0 %v2995_v10  ;;  %2870 = vmatmul.mubr.bf16.gmra.mrb[64].mxu1 %v2996_v11 }
  0xa3   :  { %2773 = vmatprep.mubr.bf16.mxu0 %v2997_v12  ;;  %2873 = vmatprep.mubr.bf16.mxu1 %v2998_v13 }
  0xaa   :  { %2774 = vmatmul.mubr.bf16.gmra.mrb[68].mxu0 %v2999_v14  ;;  %2874 = vmatmul.mubr.bf16.gmra.mrb[68].mxu1 %v3000_v15 }
  0xab   :  { %2777 = vmatprep.mubr.bf16.mxu0 %v3001_v16  ;;  %2877 = vmatprep.mubr.bf16.mxu1 %v3002_v17 }
  0xb2   :  { %2778 = vmatmul.mubr.bf16.gmra.mrb[72].mxu0 %v3003_v18  ;;  %2878 = vmatmul.mubr.bf16.gmra.mrb[72].mxu1 %v3004_v19 }
  0xb3   :  { %2781 = vmatprep.mubr.bf16.mxu0 %v3005_v20  ;;  %2881 = vmatprep.mubr.bf16.mxu1 %v3006_v21 }
  0xba   :  { %2782 = vmatmul.mubr.bf16.gmra.mrb[76].mxu0 %v3007_v22  ;;  %2882 = vmatmul.mubr.bf16.gmra.mrb[76].mxu1 %v3008_v23 }
  0xbb   :  { %2785 = vmatprep.mubr.bf16.mxu0 %v3009_v24  ;;  %2885 = vmatprep.mubr.bf16.mxu1 %v3010_v25 }
  0xc2   :  { %2786 = vmatmul.mubr.bf16.gmra.mrb[80].mxu0 %v3011_v26  ;;  %2886 = vmatmul.mubr.bf16.gmra.mrb[80].mxu1 %v3012_v27 }
  0xc3   :  { %2789 = vmatprep.mubr.bf16.mxu0 %v3013_v28  ;;  %2889 = vmatprep.mubr.bf16.mxu1 %v3014_v29 }
  0xca   :  { %2790 = vmatmul.mubr.bf16.gmra.mrb[84].mxu0 %v3015_v30  ;;  %2890 = vmatmul.mubr.bf16.gmra.mrb[84].mxu1 %v3016_v31 }
  0xcb   :  { %2793 = vmatprep.mubr.bf16.mxu0 %v3017_v32  ;;  %2893 = vmatprep.mubr.bf16.mxu1 %v3018_v33 }
  0xd2   :  { %2794 = vmatmul.mubr.bf16.gmra.mrb[88].mxu0 %v3019_v34  ;;  %2894 = vmatmul.mubr.bf16.gmra.mrb[88].mxu1 %v3020_v35 }
  0xd3   :  { %2797 = vmatprep.mubr.bf16.mxu0 %v3021_v36  ;;  %2897 = vmatprep.mubr.bf16.mxu1 %v3022_v37 }
  0xda   :  { %2798 = vmatmul.mubr.bf16.gmra.mrb[92].mxu0 %v3023_v38  ;;  %2898 = vmatmul.mubr.bf16.gmra.mrb[92].mxu1 %v3024_v39 }
  0xdb   :  { %2801 = vmatprep.mubr.bf16.mxu0 %v3025_v40  ;;  %2901 = vmatprep.mubr.bf16.mxu1 %v3026_v41 }
  0xe2   :  { %2802 = vmatmul.mubr.bf16.gmra.mrb[96].mxu0 %v3027_v42  ;;  %2902 = vmatmul.mubr.bf16.gmra.mrb[96].mxu1 %v3028_v43 }
  0xf5   :  { %v3373_v44 = vpop.f32.mrb[0].mxu0  ;;  %v3375_v45 = vpop.f32.mrb[0].mxu1 }
  0xf6   :  { %v3377_v46 = vpop.f32.mrb[1].mxu0  ;;  %v3379_v47 = vpop.f32.mrb[1].mxu1 }
  0xf7   :  { %v3381_v48 = vpop.f32.mrb[2].mxu0  ;;  %v3383_v49 = vpop.f32.mrb[2].mxu1 }
  0xf8   :  { %v3385_v50 = vpop.f32.mrb[3].mxu0  ;;  %v3387_v51 = vpop.f32.mrb[3].mxu1 }
  0xfd   :  { %v3389_v52 = vpop.f32.mrb[4].mxu0  ;;  %v3391_v53 = vpop.f32.mrb[4].mxu1 }
  0xfe   :  { %v3393_v54 = vpop.f32.mrb[5].mxu0  ;;  %v3395_v55 = vpop.f32.mrb[5].mxu1 }
  0xff   :  { %v3397_v56 = vpop.f32.mrb[6].mxu0  ;;  %v3399_v57 = vpop.f32.mrb[6].mxu1 }
 0x100   :  { %v3401_v58 = vpop.f32.mrb[7].mxu0  ;;  %v3403_v59 = vpop.f32.mrb[7].mxu1 }
 0x105   :  { %v3405_v60 = vpop.f32.mrb[8].mxu0  ;;  %v3407_v61 = vpop.f32.mrb[8].mxu1 }
 0x106   :  { %v3409_v62 = vpop.f32.mrb[9].mxu0  ;;  %v3411_v63 = vpop.f32.mrb[9].mxu1 }
 0x107   :  { %v3413_v0 = vpop.f32.mrb[10].mxu0  ;;  %v3415_v1 = vpop.f32.mrb[10].mxu1 }
 0x108   :  { %v3417_v2 = vpop.f32.mrb[11].mxu0  ;;  %v3419_v3 = vpop.f32.mrb[11].mxu1 }
 0x10d   :  { %v3421_v4 = vpop.f32.mrb[12].mxu0  ;;  %v3423_v5 = vpop.f32.mrb[12].mxu1 }
 0x10e   :  { %v3425_v6 = vpop.f32.mrb[13].mxu0  ;;  %v3427_v7 = vpop.f32.mrb[13].mxu1 }
 0x10f   :  { %v3429_v8 = vpop.f32.mrb[14].mxu0  ;;  %v3431_v9 = vpop.f32.mrb[14].mxu1 }
 0x110   :  { %v3433_v10 = vpop.f32.mrb[15].mxu0  ;;  %v3435_v11 = vpop.f32.mrb[15].mxu1 }
 0x115   :  { %v3437_v12 = vpop.f32.mrb[16].mxu0  ;;  %v3439_v13 = vpop.f32.mrb[16].mxu1 }
 0x116   :  { %v3441_v14 = vpop.f32.mrb[17].mxu0  ;;  %v3443_v15 = vpop.f32.mrb[17].mxu1 }
 0x117   :  { %v3445_v16 = vpop.f32.mrb[18].mxu0  ;;  %v3447_v17 = vpop.f32.mrb[18].mxu1 }
 0x118   :  { %v3449_v18 = vpop.f32.mrb[19].mxu0  ;;  %v3451_v19 = vpop.f32.mrb[19].mxu1 }
 0x11d   :  { %v3453_v20 = vpop.f32.mrb[20].mxu0  ;;  %v3455_v21 = vpop.f32.mrb[20].mxu1 }
 0x11e   :  { %v3457_v22 = vpop.f32.mrb[21].mxu0  ;;  %v3459_v23 = vpop.f32.mrb[21].mxu1 }
 0x11f   :  { %v3461_v24 = vpop.f32.mrb[22].mxu0  ;;  %v3463_v25 = vpop.f32.mrb[22].mxu1 }
 0x120   :  { %3807 = vst [vmem:[#allocation2_spill] sm:$0xff] %v3461_v24  ;;  %3808 = vst [vmem:[#allocation3_spill] sm:$0xff] %v3463_v25  ;;  %v3465_v26 = vpop.f32.mrb[23].mxu0  ;;  %v3467_v27 = vpop.f32.mrb[23].mxu1 }
 0x125   :  { %v3469_v28 = vpop.f32.mrb[24].mxu0  ;;  %v3471_v29 = vpop.f32.mrb[24].mxu1 }
 0x126   :  { %3809 = vst [vmem:[#allocation4_spill] sm:$0xff] %v3469_v28  ;;  %3810 = vst [vmem:[#allocation5_spill] sm:$0xff] %v3471_v29  ;;  %v3473_v30 = vpop.f32.mrb[25].mxu0  ;;  %v3475_v31 = vpop.f32.mrb[25].mxu1 }
 0x127   :  { %v3477_v32 = vpop.f32.mrb[26].mxu0  ;;  %v3479_v33 = vpop.f32.mrb[26].mxu1 }
 0x128   :  { %3811 = vst [vmem:[#allocation6_spill] sm:$0xff] %v3477_v32  ;;  %3812 = vst [vmem:[#allocation7_spill] sm:$0xff] %v3479_v33  ;;  %v3481_v34 = vpop.f32.mrb[27].mxu0  ;;  %v3483_v35 = vpop.f32.mrb[27].mxu1 }
 0x129   :  { %3813 = vst [vmem:[#allocation8_spill] sm:$0xff] %v3481_v34  ;;  %3814 = vst [vmem:[#allocation9_spill] sm:$0xff] %v3483_v35 }
 0x12d   :  { %v3485_v36 = vpop.f32.mrb[28].mxu0  ;;  %v3487_v37 = vpop.f32.mrb[28].mxu1 }
 0x12e   :  { %3815 = vst [vmem:[#allocation10_spill] sm:$0xff] %v3485_v36  ;;  %3816 = vst [vmem:[#allocation11_spill] sm:$0xff] %v3487_v37  ;;  %v3489_v38 = vpop.f32.mrb[29].mxu0  ;;  %v3491_v39 = vpop.f32.mrb[29].mxu1 }
 0x12f   :  { %3817 = vst [vmem:[#allocation12_spill] sm:$0xff] %v3489_v38  ;;  %3818 = vst [vmem:[#allocation13_spill] sm:$0xff] %v3491_v39  ;;  %v3493_v40 = vpop.f32.mrb[30].mxu0  ;;  %v3495_v41 = vpop.f32.mrb[30].mxu1 }
 0x130   :  { %3819 = vst [vmem:[#allocation14_spill] sm:$0xff] %v3493_v40  ;;  %3820 = vst [vmem:[#allocation15_spill] sm:$0xff] %v3495_v41  ;;  %v3497_v42 = vpop.f32.mrb[31].mxu0  ;;  %v3499_v43 = vpop.f32.mrb[31].mxu1 }
 0x131   :  { %3821 = vst [vmem:[#allocation16_spill] sm:$0xff] %v3497_v42  ;;  %3822 = vst [vmem:[#allocation17_spill] sm:$0xff] %v3499_v43 }
 0x135   :  { %v3501_v33 = vpop.f32.mrb[32].mxu0  ;;  %v3503_v32 = vpop.f32.mrb[32].mxu1 }
 0x136   :  { %3823 = vst [vmem:[#allocation18_spill] sm:$0xff] %v3501_v33  ;;  %3824 = vst [vmem:[#allocation19_spill] sm:$0xff] %v3503_v32  ;;  %v3505_v29 = vpop.f32.mrb[33].mxu0  ;;  %v3507_v36 = vpop.f32.mrb[33].mxu1 }
 0x137   :  { %3825 = vst [vmem:[#allocation20_spill] sm:$0xff] %v3505_v29  ;;  %3826 = vst [vmem:[#allocation21_spill] sm:$0xff] %v3507_v36  ;;  %v3509_v37 = vpop.f32.mrb[34].mxu0  ;;  %v3511_v28 = vpop.f32.mrb[34].mxu1 }
 0x138   :  { %3827 = vst [vmem:[#allocation22_spill] sm:$0xff] %v3509_v37  ;;  %3828 = vst [vmem:[#allocation23_spill] sm:$0xff] %v3511_v28  ;;  %v3513_v39 = vpop.f32.mrb[35].mxu0  ;;  %v3515_v40 = vpop.f32.mrb[35].mxu1 }
 0x139   :  { %3829 = vst [vmem:[#allocation24_spill] sm:$0xff] %v3513_v39  ;;  %3830 = vst [vmem:[#allocation25_spill] sm:$0xff] %v3515_v40 }
 0x13d   :  { %v3517_v41 = vpop.f32.mrb[36].mxu0  ;;  %v3519_v42 = vpop.f32.mrb[36].mxu1 }
 0x13e   :  { %3831 = vst [vmem:[#allocation26_spill] sm:$0xff] %v3517_v41  ;;  %3832 = vst [vmem:[#allocation27_spill] sm:$0xff] %v3519_v42  ;;  %v3521_v43 = vpop.f32.mrb[37].mxu0  ;;  %v3523_v33 = vpop.f32.mrb[37].mxu1 }
 0x13f   :  { %3833 = vst [vmem:[#allocation28_spill] sm:$0xff] %v3521_v43  ;;  %3834 = vst [vmem:[#allocation29_spill] sm:$0xff] %v3523_v33  ;;  %v3525_v32 = vpop.f32.mrb[38].mxu0  ;;  %v3527_v29 = vpop.f32.mrb[38].mxu1 }
 0x140   :  { %3835 = vst [vmem:[#allocation30_spill] sm:$0xff] %v3525_v32  ;;  %3836 = vst [vmem:[#allocation31_spill] sm:$0xff] %v3527_v29  ;;  %v3529_v36 = vpop.f32.mrb[39].mxu0  ;;  %v3531_v37 = vpop.f32.mrb[39].mxu1 }
 0x141   :  { %3837 = vst [vmem:[#allocation32_spill] sm:$0xff] %v3529_v36  ;;  %3838 = vst [vmem:[#allocation33_spill] sm:$0xff] %v3531_v37 }
 0x145   :  { %v3533_v28 = vpop.f32.mrb[40].mxu0  ;;  %v3535_v39 = vpop.f32.mrb[40].mxu1 }
 0x146   :  { %3839 = vst [vmem:[#allocation34_spill] sm:$0xff] %v3533_v28  ;;  %3840 = vst [vmem:[#allocation35_spill] sm:$0xff] %v3535_v39  ;;  %v3537_v40 = vpop.f32.mrb[41].mxu0  ;;  %v3539_v41 = vpop.f32.mrb[41].mxu1 }
 0x147   :  { %3841 = vst [vmem:[#allocation36_spill] sm:$0xff] %v3537_v40  ;;  %3842 = vst [vmem:[#allocation37_spill] sm:$0xff] %v3539_v41  ;;  %v3541_v42 = vpop.f32.mrb[42].mxu0  ;;  %v3543_v43 = vpop.f32.mrb[42].mxu1 }
 0x148   :  { %3843 = vst [vmem:[#allocation38_spill] sm:$0xff] %v3541_v42  ;;  %3844 = vst [vmem:[#allocation39_spill] sm:$0xff] %v3543_v43  ;;  %v3545_v33 = vpop.f32.mrb[43].mxu0  ;;  %v3547_v32 = vpop.f32.mrb[43].mxu1 }
 0x149   :  { %3845 = vst [vmem:[#allocation40_spill] sm:$0xff] %v3545_v33  ;;  %3846 = vst [vmem:[#allocation41_spill] sm:$0xff] %v3547_v32 }
 0x14d   :  { %v3549_v29 = vpop.f32.mrb[44].mxu0  ;;  %v3551_v36 = vpop.f32.mrb[44].mxu1 }
 0x14e   :  { %3847 = vst [vmem:[#allocation42_spill] sm:$0xff] %v3549_v29  ;;  %3848 = vst [vmem:[#allocation43_spill] sm:$0xff] %v3551_v36  ;;  %v3553_v37 = vpop.f32.mrb[45].mxu0  ;;  %v3555_v28 = vpop.f32.mrb[45].mxu1 }
 0x14f   :  { %3849 = vst [vmem:[#allocation44_spill] sm:$0xff] %v3553_v37  ;;  %3850 = vst [vmem:[#allocation45_spill] sm:$0xff] %v3555_v28  ;;  %v3557_v39 = vpop.f32.mrb[46].mxu0  ;;  %v3559_v40 = vpop.f32.mrb[46].mxu1 }
 0x150   :  { %3851 = vst [vmem:[#allocation46_spill] sm:$0xff] %v3557_v39  ;;  %3852 = vst [vmem:[#allocation47_spill] sm:$0xff] %v3559_v40  ;;  %v3561_v41 = vpop.f32.mrb[47].mxu0  ;;  %v3563_v42 = vpop.f32.mrb[47].mxu1  ;;  %v3574_v39 = vld [vmem:[%s3805_s2] ss:$0 sm:$0xff] }
 0x151   :  { %3853 = vst [vmem:[#allocation48_spill] sm:$0xff] %v3561_v41  ;;  %3854 = vst [vmem:[#allocation49_spill] sm:$0xff] %v3563_v42 }
 0x155   :  { %v2755_v43 = vpop.f32.mrb[48].mxu0  ;;  %v2855_v33 = vpop.f32.mrb[48].mxu1 }
 0x156   :  { %v1712_v32 = vmax.f32 %v3377_v46, %v2755_v43  ;;  %v1762_v29 = vmax.f32 %v3379_v47, %v2855_v33  ;;  %v3567_v38 = vpop.f32.mrb[49].mxu0  ;;  %v3569_v36 = vpop.f32.mrb[49].mxu1 }
 0x157   :  { %3855 = vst [vmem:[#allocation50_spill] sm:$0xff] %v3567_v38  ;;  %3856 = vst [vmem:[#allocation51_spill] sm:$0xff] %v3569_v36  ;;  %v2756_v40 = vpop.f32.mrb[50].mxu0  ;;  %v2856_v28 = vpop.f32.mrb[50].mxu1 }
 0x158   :  { %v1812_v41 = vmax.f32 %v1712_v32, %v1762_v29  ;;  %v1713_v42 = vmax.f32 %v3385_v50, %v2756_v40  ;;  %v1763_v37 = vmax.f32 %v3387_v51, %v2856_v28  ;;  %v3578_v25 = vpop.f32.mrb[51].mxu0  ;;  %v3580_v46 = vpop.f32.mrb[51].mxu1 }
 0x159   :  { %3857 = vst [vmem:[#allocation52_spill] sm:$0xff] %v3578_v25  ;;  %3858 = vst [vmem:[#allocation53_spill] sm:$0xff] %v3580_v46 }
 0x15a   :  { %v1869_v47 = vadd.f32 %v3574_v39, %v1812_v41  ;;  %v1813_v33 = vmax.f32 %v1713_v42, %v1763_v37 }
 0x15c   :  { %v1870_v43 = vadd.f32 %v3574_v39, %v1813_v33  ;;  %v1919_v24 = vmax.f32 %v1869_v47, 0.0 }
 0x15d   :  { %v2759_v36 = vpop.f32.mrb[52].mxu0  ;;  %v2859_v38 = vpop.f32.mrb[52].mxu1 }
 0x15e   :  { %v1920_v35 = vmax.f32 %v1870_v43, 0.0  ;;  %v1716_v34 = vmax.f32 %v3393_v54, %v2759_v36  ;;  %v1766_v29 = vmax.f32 %v3395_v55, %v2859_v38  ;;  %v1121_v50 = vpop.f32.mrb[53].mxu0  ;;  %v1521_v32 = vpop.f32.mrb[53].mxu1 }
 0x15f   :  { %v1714_v51 = vmax.f32 %v3373_v44, %v1121_v50  ;;  %v1764_v28 = vmax.f32 %v3375_v45, %v1521_v32  ;;  %v2760_v40 = vpop.f32.mrb[54].mxu0  ;;  %v2860_v46 = vpop.f32.mrb[54].mxu1 }
 0x160   :  { %v2435_v41 = vpack.c.bf16 %v1920_v35, %v1919_v24  ;;  %v1816_v37 = vmax.f32 %v1716_v34, %v1766_v29  ;;  %v1717_v42 = vmax.f32 %v3401_v58, %v2760_v40  ;;  %v1767_v33 = vmax.f32 %v3403_v59, %v2860_v46  ;;  %v1124_v47 = vpop.f32.mrb[55].mxu0  ;;  %v1524_v43 = vpop.f32.mrb[55].mxu1 }
 0x161   :  { %v1814_v25 = vmax.f32 %v1714_v51, %v1764_v28  ;;  %v1715_v54 = vmax.f32 %v3381_v48, %v1124_v47  ;;  %v1765_v55 = vmax.f32 %v3383_v49, %v1524_v43 }
 0x162   :  { %2436 = vst [vmem:[%s3806_s3] sm:$0xff] %v2435_v41   ;;  %v1873_v44 = vadd.f32 %v3574_v39, %v1816_v37  ;;  %v1817_v45 = vmax.f32 %v1717_v42, %v1767_v33 }
 0x163   :  { %v1871_v24 = vadd.f32 %v3574_v39, %v1814_v25  ;;  %v1815_v34 = vmax.f32 %v1715_v54, %v1765_v55 }
 0x164   :  { %v1874_v58 = vadd.f32 %v3574_v39, %v1817_v45  ;;  %v1923_v38 = vmax.f32 %v1873_v44, 0.0 }
 0x165   :  { %v1872_v59 = vadd.f32 %v3574_v39, %v1815_v34  ;;  %v2763_v35 = vpop.f32.mrb[56].mxu0  ;;  %v2863_v36 = vpop.f32.mrb[56].mxu1  ;;  %v1921_v32 = vmax.f32 %v1871_v24, 0.0 }
 0x166   :  { %v1924_v48 = vmax.f32 %v1874_v58, 0.0  ;;  %v1720_v49 = vmax.f32 %v3409_v62, %v2763_v35  ;;  %v1770_v46 = vmax.f32 %v3411_v63, %v2863_v36  ;;  %v1137_v29 = vpop.f32.mrb[57].mxu0  ;;  %v1537_v50 = vpop.f32.mrb[57].mxu1 }
 0x167   :  { %v1922_v51 = vmax.f32 %v1872_v59, 0.0  ;;  %v1718_v28 = vmax.f32 %v3389_v52, %v1137_v29  ;;  %v1768_v25 = vmax.f32 %v3391_v53, %v1537_v50  ;;  %v2764_v40 = vpop.f32.mrb[58].mxu0  ;;  %v2864_v41 = vpop.f32.mrb[58].mxu1 }
 0x168   :  { %v2445_v37 = vpack.c.bf16 %v1924_v48, %v1923_v38  ;;  %v1820_v42 = vmax.f32 %v1720_v49, %v1770_v46  ;;  %v1721_v33 = vmax.f32 %v3417_v2, %v2764_v40  ;;  %v1771_v47 = vmax.f32 %v3419_v3, %v2864_v41  ;;  %v1140_v43 = vpop.f32.mrb[59].mxu0  ;;  %v1540_v62 = vpop.f32.mrb[59].mxu1 }
 0x169   :  { %v2440_v54 = vpack.c.bf16 %v1922_v51, %v1921_v32  ;;  %v1818_v63 = vmax.f32 %v1718_v28, %v1768_v25  ;;  %v1719_v55 = vmax.f32 %v3397_v56, %v1140_v43  ;;  %v1769_v44 = vmax.f32 %v3399_v57, %v1540_v62 }
 0x16a   :  { %2558 = vst [vmem:[%s3806_s3 + $0x10] sm:$0xff] %v2445_v37   ;;  %v1877_v52 = vadd.f32 %v3574_v39, %v1820_v42  ;;  %v1821_v53 = vmax.f32 %v1721_v33, %v1771_v47 }
 0x16b   :  { %2557 = vst [vmem:[%s3806_s3 + $0x8] sm:$0xff] %v2440_v54   ;;  %v1875_v2 = vadd.f32 %v3574_v39, %v1818_v63  ;;  %v1819_v3 = vmax.f32 %v1719_v55, %v1769_v44 }
 0x16c   :  { %v1878_v45 = vadd.f32 %v3574_v39, %v1821_v53  ;;  %v1927_v34 = vmax.f32 %v1877_v52, 0.0 }
 0x16d   :  { %v1876_v56 = vadd.f32 %v3574_v39, %v1819_v3  ;;  %v2767_v24 = vpop.f32.mrb[60].mxu0  ;;  %v2867_v57 = vpop.f32.mrb[60].mxu1  ;;  %v1925_v48 = vmax.f32 %v1875_v2, 0.0 }
 0x16e   :  { %v1928_v58 = vmax.f32 %v1878_v45, 0.0  ;;  %v1724_v59 = vmax.f32 %v3425_v6, %v2767_v24  ;;  %v1774_v35 = vmax.f32 %v3427_v7, %v2867_v57  ;;  %v1153_v36 = vpop.f32.mrb[61].mxu0  ;;  %v1553_v38 = vpop.f32.mrb[61].mxu1 }
 0x16f   :  { %v1926_v49 = vmax.f32 %v1876_v56, 0.0  ;;  %v1722_v46 = vmax.f32 %v3405_v60, %v1153_v36  ;;  %v1772_v29 = vmax.f32 %v3407_v61, %v1553_v38  ;;  %v2768_v50 = vpop.f32.mrb[62].mxu0  ;;  %v2868_v32 = vpop.f32.mrb[62].mxu1 }
 0x170   :  { %v2455_v51 = vpack.c.bf16 %v1928_v58, %v1927_v34  ;;  %v1824_v28 = vmax.f32 %v1724_v59, %v1774_v35  ;;  %v1725_v25 = vmax.f32 %v3433_v10, %v2768_v50  ;;  %v1775_v40 = vmax.f32 %v3435_v11, %v2868_v32  ;;  %v1156_v41 = vpop.f32.mrb[63].mxu0  ;;  %v1556_v6 = vpop.f32.mrb[63].mxu1 }
 0x171   :  { %v2450_v37 = vpack.c.bf16 %v1926_v49, %v1925_v48  ;;  %v1822_v7 = vmax.f32 %v1722_v46, %v1772_v29  ;;  %v1723_v42 = vmax.f32 %v3413_v0, %v1156_v41  ;;  %v1773_v33 = vmax.f32 %v3415_v1, %v1556_v6 }
 0x172   :  { %2560 = vst [vmem:[%s3806_s3 + $0x20] sm:$0xff] %v2455_v51   ;;  %v1881_v60 = vadd.f32 %v3574_v39, %v1824_v28  ;;  %v1825_v61 = vmax.f32 %v1725_v25, %v1775_v40 }
 0x173   :  { %2559 = vst [vmem:[%s3806_s3 + $0x18] sm:$0xff] %v2450_v37   ;;  %v1879_v10 = vadd.f32 %v3574_v39, %v1822_v7  ;;  %v1823_v11 = vmax.f32 %v1723_v42, %v1773_v33 }
 0x174   :  { %v1882_v47 = vadd.f32 %v3574_v39, %v1825_v61  ;;  %v1931_v62 = vmax.f32 %v1881_v60, 0.0 }
 0x175   :  { %v1880_v0 = vadd.f32 %v3574_v39, %v1823_v11  ;;  %v2771_v43 = vpop.f32.mrb[64].mxu0  ;;  %v2871_v1 = vpop.f32.mrb[64].mxu1  ;;  %v1929_v53 = vmax.f32 %v1879_v10, 0.0 }
 0x176   :  { %v1932_v54 = vmax.f32 %v1882_v47, 0.0  ;;  %v1728_v63 = vmax.f32 %v3441_v14, %v2771_v43  ;;  %v1778_v55 = vmax.f32 %v3443_v15, %v2871_v1  ;;  %v1169_v44 = vpop.f32.mrb[65].mxu0  ;;  %v1569_v52 = vpop.f32.mrb[65].mxu1 }
 0x177   :  { %v1930_v2 = vmax.f32 %v1880_v0, 0.0  ;;  %v1726_v3 = vmax.f32 %v3421_v4, %v1169_v44  ;;  %v1776_v45 = vmax.f32 %v3423_v5, %v1569_v52  ;;  %v2772_v56 = vpop.f32.mrb[66].mxu0  ;;  %v2872_v24 = vpop.f32.mrb[66].mxu1 }
 0x178   :  { %v2465_v57 = vpack.c.bf16 %v1932_v54, %v1931_v62  ;;  %v1828_v34 = vmax.f32 %v1728_v63, %v1778_v55  ;;  %v1729_v58 = vmax.f32 %v3449_v18, %v2772_v56  ;;  %v1779_v59 = vmax.f32 %v3451_v19, %v2872_v24  ;;  %v1172_v35 = vpop.f32.mrb[67].mxu0  ;;  %v1572_v14 = vpop.f32.mrb[67].mxu1 }
 0x179   :  { %v2460_v36 = vpack.c.bf16 %v1930_v2, %v1929_v53  ;;  %v1826_v15 = vmax.f32 %v1726_v3, %v1776_v45  ;;  %v1727_v38 = vmax.f32 %v3429_v8, %v1172_v35  ;;  %v1777_v48 = vmax.f32 %v3431_v9, %v1572_v14  ;;  %v3860_v14 = vld [vmem:[#allocation9_spill] sm:$0xff] }
 0x17a   :  { %2562 = vst [vmem:[%s3806_s3 + $0x30] sm:$0xff] %v2465_v57   ;;  %v1885_v4 = vadd.f32 %v3574_v39, %v1828_v34  ;;  %v1829_v5 = vmax.f32 %v1729_v58, %v1779_v59  ;;  %v3859_v59 = vld [vmem:[#allocation8_spill] sm:$0xff] }
 0x17b   :  { %2561 = vst [vmem:[%s3806_s3 + $0x28] sm:$0xff] %v2460_v36   ;;  %v1883_v18 = vadd.f32 %v3574_v39, %v1826_v15  ;;  %v1827_v19 = vmax.f32 %v1727_v38, %v1777_v48  ;;  %v3861_v48 = vld [vmem:[#allocation2_spill] sm:$0xff] }
 0x17c   :  { %v1886_v49 = vadd.f32 %v3574_v39, %v1829_v5  ;;  %v1935_v29 = vmax.f32 %v1885_v4, 0.0  ;;  %v3862_v5 = vld [vmem:[#allocation3_spill] sm:$0xff] }
 0x17d   :  { %v1884_v8 = vadd.f32 %v3574_v39, %v1827_v19  ;;  %v2775_v46 = vpop.f32.mrb[68].mxu0  ;;  %v2875_v9 = vpop.f32.mrb[68].mxu1  ;;  %v1933_v40 = vmax.f32 %v1883_v18, 0.0 }
 0x17e   :  { %v1936_v50 = vmax.f32 %v1886_v49, 0.0  ;;  %v1732_v32 = vmax.f32 %v3457_v22, %v2775_v46  ;;  %v1782_v51 = vmax.f32 %v3459_v23, %v2875_v9  ;;  %v1185_v28 = vpop.f32.mrb[69].mxu0  ;;  %v1585_v25 = vpop.f32.mrb[69].mxu1 }
 0x17f   :  { %v1934_v41 = vmax.f32 %v1884_v8, 0.0  ;;  %v1730_v6 = vmax.f32 %v3437_v12, %v1185_v28  ;;  %v1780_v37 = vmax.f32 %v3439_v13, %v1585_v25  ;;  %v2776_v7 = vpop.f32.mrb[70].mxu0  ;;  %v2876_v42 = vpop.f32.mrb[70].mxu1  ;;  %v3864_v25 = vld [vmem:[#allocation13_spill] sm:$0xff] }
 0x180   :  { %v2475_v33 = vpack.c.bf16 %v1936_v50, %v1935_v29  ;;  %v1832_v60 = vmax.f32 %v1732_v32, %v1782_v51  ;;  %v1733_v61 = vmax.f32 %v3465_v26, %v2776_v7  ;;  %v1783_v10 = vmax.f32 %v3467_v27, %v2876_v42  ;;  %v1188_v11 = vpop.f32.mrb[71].mxu0  ;;  %v1588_v22 = vpop.f32.mrb[71].mxu1  ;;  %v3863_v51 = vld [vmem:[#allocation12_spill] sm:$0xff] }
 0x181   :  { %v2470_v47 = vpack.c.bf16 %v1934_v41, %v1933_v40  ;;  %v1830_v23 = vmax.f32 %v1730_v6, %v1780_v37  ;;  %v1731_v0 = vmax.f32 %v3445_v16, %v1188_v11  ;;  %v1781_v43 = vmax.f32 %v3447_v17, %v1588_v22  ;;  %v3865_v42 = vld [vmem:[#allocation4_spill] sm:$0xff] }
 0x182   :  { %2564 = vst [vmem:[%s3806_s3 + $0x40] sm:$0xff] %v2475_v33   ;;  %v1889_v12 = vadd.f32 %v3574_v39, %v1832_v60  ;;  %v1833_v13 = vmax.f32 %v1733_v61, %v1783_v10  ;;  %v3866_v60 = vld [vmem:[#allocation5_spill] sm:$0xff] }
 0x183   :  { %2563 = vst [vmem:[%s3806_s3 + $0x38] sm:$0xff] %v2470_v47   ;;  %v1887_v26 = vadd.f32 %v3574_v39, %v1830_v23  ;;  %v1831_v27 = vmax.f32 %v1731_v0, %v1781_v43  ;;  %v3867_v23 = vld [vmem:[#allocation16_spill] sm:$0xff]  ;;  %v3868_v43 = vld [vmem:[#allocation17_spill] sm:$0xff] }
 0x184   :  { %v1890_v1 = vadd.f32 %v3574_v39, %v1833_v13  ;;  %v1939_v54 = vmax.f32 %v1889_v12, 0.0 }
 0x185   :  { %v1888_v16 = vadd.f32 %v3574_v39, %v1831_v27  ;;  %v2779_v62 = vpop.f32.mrb[72].mxu0  ;;  %v2879_v17 = vpop.f32.mrb[72].mxu1  ;;  %v1937_v2 = vmax.f32 %v1887_v26, 0.0 }
 0x186   :  { %v1940_v63 = vmax.f32 %v1890_v1, 0.0  ;;  %v1736_v55 = vmax.f32 %v3473_v30, %v2779_v62  ;;  %v1786_v44 = vmax.f32 %v3475_v31, %v2879_v17  ;;  %v1201_v52 = vpop.f32.mrb[73].mxu0  ;;  %v1601_v53 = vpop.f32.mrb[73].mxu1  ;;  %v3870_v17 = vld [vmem:[#allocation7_spill] sm:$0xff] }
 0x187   :  { %v1938_v3 = vmax.f32 %v1888_v16, 0.0  ;;  %v1734_v45 = vmax.f32 %v3453_v20, %v1201_v52  ;;  %v1784_v56 = vmax.f32 %v3455_v21, %v1601_v53  ;;  %v2780_v24 = vpop.f32.mrb[74].mxu0  ;;  %v2880_v57 = vpop.f32.mrb[74].mxu1  ;;  %v3869_v16 = vld [vmem:[#allocation6_spill] sm:$0xff] }
 0x188   :  { %v2485_v34 = vpack.c.bf16 %v1940_v63, %v1939_v54  ;;  %v1836_v58 = vmax.f32 %v1736_v55, %v1786_v44  ;;  %v1737_v35 = vmax.f32 %v3859_v59, %v2780_v24  ;;  %v1787_v36 = vmax.f32 %v3860_v14, %v2880_v57  ;;  %v1204_v15 = vpop.f32.mrb[75].mxu0  ;;  %v1604_v30 = vpop.f32.mrb[75].mxu1  ;;  %v3871_v57 = vld [vmem:[#allocation20_spill] sm:$0xff] }
 0x189   :  { %v2480_v38 = vpack.c.bf16 %v1938_v3, %v1937_v2  ;;  %v1834_v31 = vmax.f32 %v1734_v45, %v1784_v56  ;;  %v1735_v4 = vmax.f32 %v3861_v48, %v1204_v15  ;;  %v1785_v18 = vmax.f32 %v3862_v5, %v1604_v30  ;;  %v3873_v30 = vld [vmem:[#allocation10_spill] sm:$0xff] }
 0x18a   :  { %2566 = vst [vmem:[%s3806_s3 + $0x50] sm:$0xff] %v2485_v34   ;;  %v1893_v20 = vadd.f32 %v3574_v39, %v1836_v58  ;;  %v1837_v21 = vmax.f32 %v1737_v35, %v1787_v36  ;;  %v3872_v58 = vld [vmem:[#allocation21_spill] sm:$0xff] }
 0x18b   :  { %2565 = vst [vmem:[%s3806_s3 + $0x48] sm:$0xff] %v2480_v38   ;;  %v1891_v19 = vadd.f32 %v3574_v39, %v1834_v31  ;;  %v1835_v49 = vmax.f32 %v1735_v4, %v1785_v18  ;;  %v3874_v31 = vld [vmem:[#allocation11_spill] sm:$0xff] }
 0x18c   :  { %v1894_v8 = vadd.f32 %v3574_v39, %v1837_v21  ;;  %v1943_v50 = vmax.f32 %v1893_v20, 0.0  ;;  %v3875_v21 = vld [vmem:[#allocation24_spill] sm:$0xff] }
 0x18d   :  { %v1892_v46 = vadd.f32 %v3574_v39, %v1835_v49  ;;  %v2783_v9 = vpop.f32.mrb[76].mxu0  ;;  %v2883_v29 = vpop.f32.mrb[76].mxu1  ;;  %v1941_v37 = vmax.f32 %v1891_v19, 0.0  ;;  %v3876_v49 = vld [vmem:[#allocation25_spill] sm:$0xff] }
 0x18e   :  { %v1944_v32 = vmax.f32 %v1894_v8, 0.0  ;;  %v1740_v28 = vmax.f32 %v3863_v51, %v2783_v9  ;;  %v1790_v40 = vmax.f32 %v3864_v25, %v2883_v29  ;;  %v1217_v41 = vpop.f32.mrb[77].mxu0  ;;  %v1617_v6 = vpop.f32.mrb[77].mxu1 }
 0x18f   :  { %v1942_v7 = vmax.f32 %v1892_v46, 0.0  ;;  %v1738_v33 = vmax.f32 %v3865_v42, %v1217_v41  ;;  %v1788_v61 = vmax.f32 %v3866_v60, %v1617_v6  ;;  %v2784_v10 = vpop.f32.mrb[78].mxu0  ;;  %v2884_v11 = vpop.f32.mrb[78].mxu1 }
 0x190   :  { %v2495_v22 = vpack.c.bf16 %v1944_v32, %v1943_v50  ;;  %v1840_v47 = vmax.f32 %v1740_v28, %v1790_v40  ;;  %v1741_v0 = vmax.f32 %v3867_v23, %v2784_v10  ;;  %v1791_v12 = vmax.f32 %v3868_v43, %v2884_v11  ;;  %v1220_v13 = vpop.f32.mrb[79].mxu0  ;;  %v1620_v26 = vpop.f32.mrb[79].mxu1  ;;  %v3877_v32 = vld [vmem:[#allocation14_spill] sm:$0xff]  ;;  %v3878_v28 = vld [vmem:[#allocation15_spill] sm:$0xff]  ;;  %v3879_v11 = vld [vmem:[#allocation28_spill] sm:$0xff] }
 0x191   :  { %v2490_v27 = vpack.c.bf16 %v1942_v7, %v1941_v37  ;;  %v1838_v1 = vmax.f32 %v1738_v33, %v1788_v61  ;;  %v1739_v62 = vmax.f32 %v3869_v16, %v1220_v13  ;;  %v1789_v54 = vmax.f32 %v3870_v17, %v1620_v26  ;;  %v3881_v26 = vld [vmem:[#allocation18_spill] sm:$0xff] }
 0x192   :  { %2568 = vst [vmem:[%s3806_s3 + $0x60] sm:$0xff] %v2495_v22   ;;  %v1897_v63 = vadd.f32 %v3574_v39, %v1840_v47  ;;  %v1841_v55 = vmax.f32 %v1741_v0, %v1791_v12  ;;  %v3880_v47 = vld [vmem:[#allocation29_spill] sm:$0xff] }
 0x193   :  { %2567 = vst [vmem:[%s3806_s3 + $0x58] sm:$0xff] %v2490_v27   ;;  %v1895_v44 = vadd.f32 %v3574_v39, %v1838_v1  ;;  %v1839_v52 = vmax.f32 %v1739_v62, %v1789_v54  ;;  %v3882_v1 = vld [vmem:[#allocation19_spill] sm:$0xff] }
 0x194   :  { %v1898_v53 = vadd.f32 %v3574_v39, %v1841_v55  ;;  %v1947_v56 = vmax.f32 %v1897_v63, 0.0  ;;  %v3883_v55 = vld [vmem:[#allocation32_spill] sm:$0xff] }
 0x195   :  { %v1896_v2 = vadd.f32 %v3574_v39, %v1839_v52  ;;  %v2787_v3 = vpop.f32.mrb[80].mxu0  ;;  %v2887_v45 = vpop.f32.mrb[80].mxu1  ;;  %v1945_v36 = vmax.f32 %v1895_v44, 0.0  ;;  %v3884_v52 = vld [vmem:[#allocation33_spill] sm:$0xff] }
 0x196   :  { %v1948_v24 = vmax.f32 %v1898_v53, 0.0  ;;  %v1744_v34 = vmax.f32 %v3871_v57, %v2787_v3  ;;  %v1794_v59 = vmax.f32 %v3872_v58, %v2887_v45  ;;  %v1233_v35 = vpop.f32.mrb[81].mxu0  ;;  %v1633_v14 = vpop.f32.mrb[81].mxu1 }
 0x197   :  { %v1946_v15 = vmax.f32 %v1896_v2, 0.0  ;;  %v1742_v38 = vmax.f32 %v3873_v30, %v1233_v35  ;;  %v1792_v48 = vmax.f32 %v3874_v31, %v1633_v14  ;;  %v2788_v4 = vpop.f32.mrb[82].mxu0  ;;  %v2888_v5 = vpop.f32.mrb[82].mxu1 }
 0x198   :  { %v2505_v18 = vpack.c.bf16 %v1948_v24, %v1947_v56  ;;  %v1844_v20 = vmax.f32 %v1744_v34, %v1794_v59  ;;  %v1745_v19 = vmax.f32 %v3875_v21, %v2788_v4  ;;  %v1795_v8 = vmax.f32 %v3876_v49, %v2888_v5  ;;  %v1236_v46 = vpop.f32.mrb[83].mxu0  ;;  %v1636_v9 = vpop.f32.mrb[83].mxu1  ;;  %v3885_v24 = vld [vmem:[#allocation22_spill] sm:$0xff]  ;;  %v3886_v34 = vld [vmem:[#allocation23_spill] sm:$0xff]  ;;  %v3887_v5 = vld [vmem:[#allocation36_spill] sm:$0xff] }
 0x199   :  { %v2500_v29 = vpack.c.bf16 %v1946_v15, %v1945_v36  ;;  %v1842_v50 = vmax.f32 %v1742_v38, %v1792_v48  ;;  %v1743_v51 = vmax.f32 %v3877_v32, %v1236_v46  ;;  %v1793_v25 = vmax.f32 %v3878_v28, %v1636_v9  ;;  %v3889_v9 = vld [vmem:[#allocation26_spill] sm:$0xff] }
 0x19a   :  { %2570 = vst [vmem:[%s3806_s3 + $0x70] sm:$0xff] %v2505_v18   ;;  %v1901_v40 = vadd.f32 %v3574_v39, %v1844_v20  ;;  %v1845_v41 = vmax.f32 %v1745_v19, %v1795_v8  ;;  %v3888_v20 = vld [vmem:[#allocation37_spill] sm:$0xff] }
 0x19b   :  { %2569 = vst [vmem:[%s3806_s3 + $0x68] sm:$0xff] %v2500_v29   ;;  %v1899_v6 = vadd.f32 %v3574_v39, %v1842_v50  ;;  %v1843_v37 = vmax.f32 %v1743_v51, %v1793_v25  ;;  %v3890_v50 = vld [vmem:[#allocation27_spill] sm:$0xff] }
 0x19c   :  { %v1902_v7 = vadd.f32 %v3574_v39, %v1845_v41  ;;  %v1951_v61 = vmax.f32 %v1901_v40, 0.0  ;;  %v3891_v41 = vld [vmem:[#allocation40_spill] sm:$0xff] }
 0x19d   :  { %v1900_v42 = vadd.f32 %v3574_v39, %v1843_v37  ;;  %v2791_v33 = vpop.f32.mrb[84].mxu0  ;;  %v2891_v60 = vpop.f32.mrb[84].mxu1  ;;  %v1949_v12 = vmax.f32 %v1899_v6, 0.0  ;;  %v3892_v37 = vld [vmem:[#allocation41_spill] sm:$0xff] }
 0x19e   :  { %v1952_v10 = vmax.f32 %v1902_v7, 0.0  ;;  %v1748_v22 = vmax.f32 %v3879_v11, %v2791_v33  ;;  %v1798_v23 = vmax.f32 %v3880_v47, %v2891_v60  ;;  %v1249_v0 = vpop.f32.mrb[85].mxu0  ;;  %v1649_v43 = vpop.f32.mrb[85].mxu1 }
 0x19f   :  { %v1950_v13 = vmax.f32 %v1900_v42, 0.0  ;;  %v1746_v27 = vmax.f32 %v3881_v26, %v1249_v0  ;;  %v1796_v16 = vmax.f32 %v3882_v1, %v1649_v43  ;;  %v2792_v62 = vpop.f32.mrb[86].mxu0  ;;  %v2892_v17 = vpop.f32.mrb[86].mxu1 }
 0x1a0   :  { %v2515_v54 = vpack.c.bf16 %v1952_v10, %v1951_v61  ;;  %v1848_v63 = vmax.f32 %v1748_v22, %v1798_v23  ;;  %v1749_v44 = vmax.f32 %v3883_v55, %v2792_v62  ;;  %v1799_v53 = vmax.f32 %v3884_v52, %v2892_v17  ;;  %v1252_v2 = vpop.f32.mrb[87].mxu0  ;;  %v1652_v3 = vpop.f32.mrb[87].mxu1  ;;  %v3893_v10 = vld [vmem:[#allocation30_spill] sm:$0xff]  ;;  %v3894_v22 = vld [vmem:[#allocation31_spill] sm:$0xff]  ;;  %v3895_v17 = vld [vmem:[#allocation44_spill] sm:$0xff] }
 0x1a1   :  { %v2510_v45 = vpack.c.bf16 %v1950_v13, %v1949_v12  ;;  %v1846_v56 = vmax.f32 %v1746_v27, %v1796_v16  ;;  %v1747_v57 = vmax.f32 %v3885_v24, %v1252_v2  ;;  %v1797_v58 = vmax.f32 %v3886_v34, %v1652_v3  ;;  %v3897_v3 = vld [vmem:[#allocation34_spill] sm:$0xff] }
 0x1a2   :  { %2572 = vst [vmem:[%s3806_s3 + $0x80] sm:$0xff] %v2515_v54   ;;  %v1905_v59 = vadd.f32 %v3574_v39, %v1848_v63  ;;  %v1849_v35 = vmax.f32 %v1749_v44, %v1799_v53  ;;  %v3896_v63 = vld [vmem:[#allocation45_spill] sm:$0xff] }
 0x1a3   :  { %2571 = vst [vmem:[%s3806_s3 + $0x78] sm:$0xff] %v2510_v45   ;;  %v1903_v14 = vadd.f32 %v3574_v39, %v1846_v56  ;;  %v1847_v36 = vmax.f32 %v1747_v57, %v1797_v58  ;;  %v3898_v56 = vld [vmem:[#allocation35_spill] sm:$0xff] }
 0x1a4   :  { %v1906_v15 = vadd.f32 %v3574_v39, %v1849_v35  ;;  %v1955_v48 = vmax.f32 %v1905_v59, 0.0  ;;  %v3899_v35 = vld [vmem:[#allocation48_spill] sm:$0xff] }
 0x1a5   :  { %v1904_v30 = vadd.f32 %v3574_v39, %v1847_v36  ;;  %v2795_v38 = vpop.f32.mrb[88].mxu0  ;;  %v2895_v31 = vpop.f32.mrb[88].mxu1  ;;  %v1953_v8 = vmax.f32 %v1903_v14, 0.0  ;;  %v3900_v36 = vld [vmem:[#allocation49_spill] sm:$0xff] }
 0x1a6   :  { %v1956_v4 = vmax.f32 %v1906_v15, 0.0  ;;  %v1752_v18 = vmax.f32 %v3887_v5, %v2795_v38  ;;  %v1802_v21 = vmax.f32 %v3888_v20, %v2895_v31  ;;  %v1265_v19 = vpop.f32.mrb[89].mxu0  ;;  %v1665_v49 = vpop.f32.mrb[89].mxu1 }
 0x1a7   :  { %v1954_v46 = vmax.f32 %v1904_v30, 0.0  ;;  %v1750_v29 = vmax.f32 %v3889_v9, %v1265_v19  ;;  %v1800_v32 = vmax.f32 %v3890_v50, %v1665_v49  ;;  %v2796_v51 = vpop.f32.mrb[90].mxu0  ;;  %v2896_v28 = vpop.f32.mrb[90].mxu1 }
 0x1a8   :  { %v2525_v25 = vpack.c.bf16 %v1956_v4, %v1955_v48  ;;  %v1852_v40 = vmax.f32 %v1752_v18, %v1802_v21  ;;  %v1753_v6 = vmax.f32 %v3891_v41, %v2796_v51  ;;  %v1803_v7 = vmax.f32 %v3892_v37, %v2896_v28  ;;  %v1268_v42 = vpop.f32.mrb[91].mxu0  ;;  %v1668_v33 = vpop.f32.mrb[91].mxu1  ;;  %v3901_v4 = vld [vmem:[#allocation38_spill] sm:$0xff]  ;;  %v3902_v18 = vld [vmem:[#allocation39_spill] sm:$0xff] }
 0x1a9   :  { %v2520_v60 = vpack.c.bf16 %v1954_v46, %v1953_v8  ;;  %v1850_v61 = vmax.f32 %v1750_v29, %v1800_v32  ;;  %v1751_v11 = vmax.f32 %v3893_v10, %v1268_v42  ;;  %v1801_v47 = vmax.f32 %v3894_v22, %v1668_v33  ;;  %v3903_v28 = vld [vmem:[#allocation50_spill] sm:$0xff] }
 0x1aa   :  { %2574 = vst [vmem:[%s3806_s3 + $0x90] sm:$0xff] %v2525_v25   ;;  %v1909_v23 = vadd.f32 %v3574_v39, %v1852_v40  ;;  %v1853_v0 = vmax.f32 %v1753_v6, %v1803_v7  ;;  %v3904_v40 = vld [vmem:[#allocation51_spill] sm:$0xff]  ;;  %v3905_v33 = vld [vmem:[#allocation42_spill] sm:$0xff] }
 0x1ab   :  { %2573 = vst [vmem:[%s3806_s3 + $0x88] sm:$0xff] %v2520_v60   ;;  %v1907_v43 = vadd.f32 %v3574_v39, %v1850_v61  ;;  %v1851_v12 = vmax.f32 %v1751_v11, %v1801_v47  ;;  %v3906_v61 = vld [vmem:[#allocation43_spill] sm:$0xff] }
 0x1ac   :  { %v1910_v13 = vadd.f32 %v3574_v39, %v1853_v0  ;;  %v1959_v16 = vmax.f32 %v1909_v23, 0.0  ;;  %v3907_v0 = vld [vmem:[#allocation52_spill] sm:$0xff] }
 0x1ad   :  { %v1908_v26 = vadd.f32 %v3574_v39, %v1851_v12  ;;  %v2799_v27 = vpop.f32.mrb[92].mxu0  ;;  %v2899_v1 = vpop.f32.mrb[92].mxu1  ;;  %v1957_v53 = vmax.f32 %v1907_v43, 0.0  ;;  %v3908_v12 = vld [vmem:[#allocation53_spill] sm:$0xff] }
 0x1ae   :  { %v1960_v62 = vmax.f32 %v1910_v13, 0.0  ;;  %v1756_v54 = vmax.f32 %v3895_v17, %v2799_v27  ;;  %v1806_v55 = vmax.f32 %v3896_v63, %v2899_v1  ;;  %v1281_v44 = vpop.f32.mrb[93].mxu0  ;;  %v1681_v52 = vpop.f32.mrb[93].mxu1 }
 0x1af   :  { %v1958_v2 = vmax.f32 %v1908_v26, 0.0  ;;  %v1754_v45 = vmax.f32 %v3897_v3, %v1281_v44  ;;  %v1804_v24 = vmax.f32 %v3898_v56, %v1681_v52  ;;  %v2800_v57 = vpop.f32.mrb[94].mxu0  ;;  %v2900_v34 = vpop.f32.mrb[94].mxu1 }
 0x1b0   :  { %v2535_v58 = vpack.c.bf16 %v1960_v62, %v1959_v16  ;;  %v1856_v59 = vmax.f32 %v1756_v54, %v1806_v55  ;;  %v1757_v14 = vmax.f32 %v3899_v35, %v2800_v57  ;;  %v1807_v15 = vmax.f32 %v3900_v36, %v2900_v34  ;;  %v1284_v30 = vpop.f32.mrb[95].mxu0  ;;  %v1684_v38 = vpop.f32.mrb[95].mxu1  ;;  %v3909_v62 = vld [vmem:[#allocation46_spill] sm:$0xff]  ;;  %v3910_v54 = vld [vmem:[#allocation47_spill] sm:$0xff] }
 0x1b1   :  { %v2530_v31 = vpack.c.bf16 %v1958_v2, %v1957_v53  ;;  %v1854_v48 = vmax.f32 %v1754_v45, %v1804_v24  ;;  %v1755_v5 = vmax.f32 %v3901_v4, %v1284_v30  ;;  %v1805_v20 = vmax.f32 %v3902_v18, %v1684_v38 }
 0x1b2   :  { %2576 = vst [vmem:[%s3806_s3 + $0xa0] sm:$0xff] %v2535_v58   ;;  %v1913_v21 = vadd.f32 %v3574_v39, %v1856_v59  ;;  %v1857_v19 = vmax.f32 %v1757_v14, %v1807_v15 }
 0x1b3   :  { %2575 = vst [vmem:[%s3806_s3 + $0x98] sm:$0xff] %v2530_v31   ;;  %v1911_v49 = vadd.f32 %v3574_v39, %v1854_v48  ;;  %v1855_v8 = vmax.f32 %v1755_v5, %v1805_v20 }
 0x1b4   :  { %v1914_v46 = vadd.f32 %v3574_v39, %v1857_v19  ;;  %v1963_v32 = vmax.f32 %v1913_v21, 0.0 }
 0x1b5   :  { %v1912_v9 = vadd.f32 %v3574_v39, %v1855_v8  ;;  %v2803_v29 = vpop.f32.mrb[96].mxu0  ;;  %v2903_v50 = vpop.f32.mrb[96].mxu1  ;;  %v1961_v7 = vmax.f32 %v1911_v49, 0.0 }
 0x1b6   :  { %v1964_v51 = vmax.f32 %v1914_v46, 0.0  ;;  %v1760_v25 = vmax.f32 %v3903_v28, %v2803_v29  ;;  %v1810_v41 = vmax.f32 %v3904_v40, %v2903_v50  ;;  %v1297_v6 = vpop.f32.mrb[97].mxu0  ;;  %v1697_v37 = vpop.f32.mrb[97].mxu1 }
 0x1b7   :  { %v1962_v42 = vmax.f32 %v1912_v9, 0.0  ;;  %v1758_v60 = vmax.f32 %v3905_v33, %v1297_v6  ;;  %v1808_v10 = vmax.f32 %v3906_v61, %v1697_v37  ;;  %v2804_v11 = vpop.f32.mrb[98].mxu0  ;;  %v2904_v22 = vpop.f32.mrb[98].mxu1 }
 0x1b8   :  { %v2545_v47 = vpack.c.bf16 %v1964_v51, %v1963_v32  ;;  %v1860_v23 = vmax.f32 %v1760_v25, %v1810_v41  ;;  %v1761_v43 = vmax.f32 %v3907_v0, %v2804_v11  ;;  %v1811_v13 = vmax.f32 %v3908_v12, %v2904_v22  ;;  %v1300_v26 = vpop.f32.mrb[99].mxu0  ;;  %v1700_v27 = vpop.f32.mrb[99].mxu1 }
 0x1b9   :  { %v2540_v1 = vpack.c.bf16 %v1962_v42, %v1961_v7  ;;  %v1858_v16 = vmax.f32 %v1758_v60, %v1808_v10  ;;  %v1759_v17 = vmax.f32 %v3909_v62, %v1300_v26  ;;  %v1809_v63 = vmax.f32 %v3910_v54, %v1700_v27 }
 0x1ba   :  { %2578 = vst [vmem:[%s3806_s3 + $0xb0] sm:$0xff] %v2545_v47   ;;  %v1917_v55 = vadd.f32 %v3574_v39, %v1860_v23  ;;  %v1861_v44 = vmax.f32 %v1761_v43, %v1811_v13 }
 0x1bb   :  { %2577 = vst [vmem:[%s3806_s3 + $0xa8] sm:$0xff] %v2540_v1   ;;  %v1915_v52 = vadd.f32 %v3574_v39, %v1858_v16  ;;  %v1859_v53 = vmax.f32 %v1759_v17, %v1809_v63 }
 0x1bc   :  { %v1918_v2 = vadd.f32 %v3574_v39, %v1861_v44  ;;  %v1967_v45 = vmax.f32 %v1917_v55, 0.0 }
 0x1bd   :  { %v1916_v3 = vadd.f32 %v3574_v39, %v1859_v53  ;;  %v1965_v24 = vmax.f32 %v1915_v52, 0.0 }
 0x1be   :  { %v1968_v56 = vmax.f32 %v1918_v2, 0.0 }
 0x1bf   :  { %v1966_v57 = vmax.f32 %v1916_v3, 0.0 }
 0x1c0   :  { %v2555_v34 = vpack.c.bf16 %v1968_v56, %v1967_v45 }
 0x1c1   :  { %v2550_v58 = vpack.c.bf16 %v1966_v57, %v1965_v24 }
 0x1c2   :  { %2580 = vst [vmem:[%s3806_s3 + $0xc0] sm:$0xff] %v2555_v34  }
 0x1c3   :  { %2579 = vst [vmem:[%s3806_s3 + $0xb8] sm:$0xff] %v2550_v58  }

// kernel: lenet_forward.4
= control target key start
LH: loop header
LB: loop body
LE: loop exit
PB: predicated region body
PF: predicated region fallthrough
CT: control target
= control target key end

     0   :  { %s1092_s1 = inlined_call_operand.vmem [shape: bf16[256,128], index: 1, kind: input, shape index: {}]   ;;  %s1093_s0 = inlined_call_operand.vmem [shape: bf16[256,256], index: 0, kind: input, shape index: {}]   ;;  %s1094_s2 = inlined_call_operand.vmem [shape: f32[1,128], index: 2, kind: input, shape index: {}]   ;;  %s1095_s3 = inlined_call_operand.vmem [shape: bf16[64,128], index: 3, kind: output, shape index: {}]  }
   0x1   :  { %v803_v0 = vld [vmem:[%s1092_s1 + $0x40] sm:$0xff]   ;;  %v805_v2 = vld [vmem:[%s1092_s1 + $0x48] sm:$0xff]   ;;  %v807_v4 = vld [vmem:[%s1092_s1 + $0x50] sm:$0xff]  }
   0x2   :  { %v804_v1 = vld [vmem:[%s1092_s1] sm:$0xff]   ;;  %675 = vmatprep.subr.bf16.mxu0 %v803_v0  ;;  %787 = vmatprep.subr.bf16.mxu1 %v803_v0  ;;  %v806_v3 = vld [vmem:[%s1092_s1 + $0x8] sm:$0xff]   ;;  %v808_v5 = vld [vmem:[%s1092_s1 + $0x10] sm:$0xff]  }
   0x3   :  { %676 = vmatpush3.bf16.msra.mxu0 %v804_v1  ;;  %795 = vmatpush3.bf16.msra.mxu1 %v804_v1  ;;  %v809_v6 = vld [vmem:[%s1092_s1 + $0x58] sm:$0xff]   ;;  %v811_v8 = vld [vmem:[%s1092_s1 + $0x60] sm:$0xff]   ;;  %v813_v10 = vld [vmem:[%s1092_s1 + $0x68] sm:$0xff]  }
   0x4   :  { %677 = vmatprep.subr.bf16.mxu0 %v805_v2  ;;  %788 = vmatprep.subr.bf16.mxu1 %v805_v2  ;;  %v810_v7 = vld [vmem:[%s1092_s1 + $0x18] sm:$0xff]   ;;  %v812_v9 = vld [vmem:[%s1092_s1 + $0x20] sm:$0xff]   ;;  %v814_v13 = vld [vmem:[%s1092_s1 + $0x28] sm:$0xff]  }
   0x5   :  { %v821_v11 = vld [vmem:[%s1093_s0 + $0x4] ss:$8 sps:$4 sm:$0xff]   ;;  %v815_v14 = vld [vmem:[%s1092_s1 + $0x70] sm:$0xff]   ;;  %v817_v16 = vld [vmem:[%s1092_s1 + $0x78] sm:$0xff]  }
   0x6   :  { %v824_v12 = vld [vmem:[%s1093_s0 + $0x84] ss:$8 sps:$4 sm:$0xff]   ;;  %367 = vmatprep.mubr.bf16.mxu0 %v821_v11  ;;  %v816_v15 = vld [vmem:[%s1092_s1 + $0x30] sm:$0xff]   ;;  %v818_v17 = vld [vmem:[%s1092_s1 + $0x38] sm:$0xff]  }
   0x7   :  { %678 = vmatpush3.bf16.msra.mxu0 %v806_v3  ;;  %796 = vmatpush3.bf16.msra.mxu1 %v806_v3  ;;  %v819_v18 = vld [vmem:[%s1093_s0] ss:$8 sps:$4 sm:$0xff]   ;;  %v825_v20 = vld [vmem:[%s1093_s0 + $0x14] ss:$8 sps:$4 sm:$0xff]   ;;  %v829_v22 = vld [vmem:[%s1093_s0 + $0x10] ss:$8 sps:$4 sm:$0xff]  }
   0x8   :  { %679 = vmatprep.subr.bf16.mxu0 %v807_v4  ;;  %789 = vmatprep.subr.bf16.mxu1 %v807_v4  ;;  %v822_v19 = vld [vmem:[%s1093_s0 + $0x80] ss:$8 sps:$4 sm:$0xff]   ;;  %v827_v21 = vld [vmem:[%s1093_s0 + $0x94] ss:$8 sps:$4 sm:$0xff]   ;;  %v830_v23 = vld [vmem:[%s1093_s0 + $0x90] ss:$8 sps:$4 sm:$0xff]  }
   0x9   :  { %431 = vmatprep.mubr.bf16.mxu1 %v824_v12  ;;  %v831_v24 = vld [vmem:[%s1093_s0 + $0x24] ss:$8 sps:$4 sm:$0xff]   ;;  %v835_v26 = vld [vmem:[%s1093_s0 + $0x20] ss:$8 sps:$4 sm:$0xff]   ;;  %v837_v28 = vld [vmem:[%s1093_s0 + $0x34] ss:$8 sps:$4 sm:$0xff]  }
   0xa   :  { %v833_v25 = vld [vmem:[%s1093_s0 + $0xa4] ss:$8 sps:$4 sm:$0xff]   ;;  %v836_v27 = vld [vmem:[%s1093_s0 + $0xa0] ss:$8 sps:$4 sm:$0xff]   ;;  %v839_v29 = vld [vmem:[%s1093_s0 + $0xb4] ss:$8 sps:$4 sm:$0xff]  }
   0xb   :  { %680 = vmatpush3.bf16.msra.mxu0 %v808_v5  ;;  %797 = vmatpush3.bf16.msra.mxu1 %v808_v5  ;;  %v841_v30 = vld [vmem:[%s1093_s0 + $0x30] ss:$8 sps:$4 sm:$0xff]   ;;  %v843_v32 = vld [vmem:[%s1093_s0 + $0x44] ss:$8 sps:$4 sm:$0xff]   ;;  %v847_v34 = vld [vmem:[%s1093_s0 + $0x40] ss:$8 sps:$4 sm:$0xff]  }
   0xc   :  { %681 = vmatprep.subr.bf16.mxu0 %v809_v6  ;;  %790 = vmatprep.subr.bf16.mxu1 %v809_v6  ;;  %v842_v31 = vld [vmem:[%s1093_s0 + $0xb0] ss:$8 sps:$4 sm:$0xff]   ;;  %v845_v33 = vld [vmem:[%s1093_s0 + $0xc4] ss:$8 sps:$4 sm:$0xff]   ;;  %v848_v35 = vld [vmem:[%s1093_s0 + $0xc0] ss:$8 sps:$4 sm:$0xff]  }
   0xd   :  { %v849_v36 = vld [vmem:[%s1093_s0 + $0x54] ss:$8 sps:$4 sm:$0xff]   ;;  %v853_v38 = vld [vmem:[%s1093_s0 + $0x50] ss:$8 sps:$4 sm:$0xff]   ;;  %v855_v40 = vld [vmem:[%s1093_s0 + $0x64] ss:$8 sps:$4 sm:$0xff]  }
   0xe   :  { %v851_v37 = vld [vmem:[%s1093_s0 + $0xd4] ss:$8 sps:$4 sm:$0xff]   ;;  %v854_v39 = vld [vmem:[%s1093_s0 + $0xd0] ss:$8 sps:$4 sm:$0xff]   ;;  %v857_v41 = vld [vmem:[%s1093_s0 + $0xe4] ss:$8 sps:$4 sm:$0xff]  }
   0xf   :  { %682 = vmatpush3.bf16.msra.mxu0 %v810_v7  ;;  %798 = vmatpush3.bf16.msra.mxu1 %v810_v7  ;;  %v859_v42 = vld [vmem:[%s1093_s0 + $0x60] ss:$8 sps:$4 sm:$0xff]   ;;  %v861_v44 = vld [vmem:[%s1093_s0 + $0x74] ss:$8 sps:$4 sm:$0xff]   ;;  %v865_v46 = vld [vmem:[%s1093_s0 + $0x70] ss:$8 sps:$4 sm:$0xff]  }
  0x10   :  { %683 = vmatprep.subr.bf16.mxu0 %v811_v8  ;;  %791 = vmatprep.subr.bf16.mxu1 %v811_v8  ;;  %v860_v43 = vld [vmem:[%s1093_s0 + $0xe0] ss:$8 sps:$4 sm:$0xff]   ;;  %v863_v45 = vld [vmem:[%s1093_s0 + $0xf4] ss:$8 sps:$4 sm:$0xff]   ;;  %v866_v47 = vld [vmem:[%s1093_s0 + $0xf0] ss:$8 sps:$4 sm:$0xff]  }
  0x13   :  { %684 = vmatpush3.bf16.msra.mxu0 %v812_v9  ;;  %799 = vmatpush3.bf16.msra.mxu1 %v812_v9 }
  0x14   :  { %685 = vmatprep.subr.bf16.mxu0 %v813_v10  ;;  %792 = vmatprep.subr.bf16.mxu1 %v813_v10 }
  0x17   :  { %686 = vmatpush3.bf16.msra.mxu0 %v814_v13  ;;  %800 = vmatpush3.bf16.msra.mxu1 %v814_v13 }
  0x18   :  { %687 = vmatprep.subr.bf16.mxu0 %v815_v14  ;;  %793 = vmatprep.subr.bf16.mxu1 %v815_v14 }
  0x1b   :  { %688 = vmatpush3.bf16.msra.mxu0 %v816_v15  ;;  %801 = vmatpush3.bf16.msra.mxu1 %v816_v15 }
  0x1c   :  { %689 = vmatprep.subr.bf16.mxu0 %v817_v16  ;;  %794 = vmatprep.subr.bf16.mxu1 %v817_v16 }
  0x1f   :  { %690 = vmatpush3.bf16.msra.mxu0 %v818_v17  ;;  %802 = vmatpush3.bf16.msra.mxu1 %v818_v17 }
  0x22   :  { %368 = vmatmul.mubr.bf16.vlgmr.msra.gmra.mrb[0].mxu0 %v819_v18  ;;  %432 = vmatmul.mubr.bf16.vlgmr.msra.gmra.mrb[0].mxu1 %v822_v19 }
  0x23   :  { %375 = vmatprep.mubr.bf16.mxu0 %v825_v20  ;;  %439 = vmatprep.mubr.bf16.mxu1 %v827_v21 }
  0x2a   :  { %376 = vmatmul.mubr.bf16.gmra.mrb[4].mxu0 %v829_v22  ;;  %440 = vmatmul.mubr.bf16.gmra.mrb[4].mxu1 %v830_v23 }
  0x2b   :  { %383 = vmatprep.mubr.bf16.mxu0 %v831_v24  ;;  %447 = vmatprep.mubr.bf16.mxu1 %v833_v25 }
  0x32   :  { %384 = vmatmul.mubr.bf16.gmra.mrb[8].mxu0 %v835_v26  ;;  %448 = vmatmul.mubr.bf16.gmra.mrb[8].mxu1 %v836_v27 }
  0x33   :  { %391 = vmatprep.mubr.bf16.mxu0 %v837_v28  ;;  %455 = vmatprep.mubr.bf16.mxu1 %v839_v29 }
  0x3a   :  { %392 = vmatmul.mubr.bf16.gmra.mrb[12].mxu0 %v841_v30  ;;  %456 = vmatmul.mubr.bf16.gmra.mrb[12].mxu1 %v842_v31 }
  0x3b   :  { %399 = vmatprep.mubr.bf16.mxu0 %v843_v32  ;;  %463 = vmatprep.mubr.bf16.mxu1 %v845_v33 }
  0x42   :  { %400 = vmatmul.mubr.bf16.gmra.mrb[16].mxu0 %v847_v34  ;;  %464 = vmatmul.mubr.bf16.gmra.mrb[16].mxu1 %v848_v35 }
  0x43   :  { %407 = vmatprep.mubr.bf16.mxu0 %v849_v36  ;;  %471 = vmatprep.mubr.bf16.mxu1 %v851_v37 }
  0x4a   :  { %408 = vmatmul.mubr.bf16.gmra.mrb[20].mxu0 %v853_v38  ;;  %472 = vmatmul.mubr.bf16.gmra.mrb[20].mxu1 %v854_v39 }
  0x4b   :  { %415 = vmatprep.mubr.bf16.mxu0 %v855_v40  ;;  %479 = vmatprep.mubr.bf16.mxu1 %v857_v41 }
  0x52   :  { %416 = vmatmul.mubr.bf16.gmra.mrb[24].mxu0 %v859_v42  ;;  %480 = vmatmul.mubr.bf16.gmra.mrb[24].mxu1 %v860_v43 }
  0x53   :  { %423 = vmatprep.mubr.bf16.mxu0 %v861_v44  ;;  %487 = vmatprep.mubr.bf16.mxu1 %v863_v45 }
  0x5a   :  { %424 = vmatmul.mubr.bf16.gmra.mrb[28].mxu0 %v865_v46  ;;  %488 = vmatmul.mubr.bf16.gmra.mrb[28].mxu1 %v866_v47  ;;  %v1058_v46 = vld [vmem:[%s1094_s2] ss:$0 sm:$0xff] }
  0xf5   :  { %v691_v48 = vpop.f32.mrb[0].mxu0  ;;  %v739_v49 = vpop.f32.mrb[0].mxu1 }
  0xf6   :  { %v692_v50 = vpop.f32.mrb[1].mxu0  ;;  %v740_v51 = vpop.f32.mrb[1].mxu1 }
  0xf7   :  { %v693_v52 = vadd.f32 %v692_v50, %v691_v48  ;;  %v741_v53 = vadd.f32 %v740_v51, %v739_v49  ;;  %v694_v54 = vpop.f32.mrb[2].mxu0  ;;  %v742_v55 = vpop.f32.mrb[2].mxu1 }
  0xf8   :  { %v695_v56 = vpop.f32.mrb[3].mxu0  ;;  %v743_v57 = vpop.f32.mrb[3].mxu1 }
  0xf9   :  { %v696_v58 = vadd.f32 %v695_v56, %v694_v54  ;;  %v744_v59 = vadd.f32 %v743_v57, %v742_v55 }
  0xfd   :  { %v697_v60 = vpop.f32.mrb[4].mxu0  ;;  %v745_v61 = vpop.f32.mrb[4].mxu1 }
  0xfe   :  { %v698_v62 = vpop.f32.mrb[5].mxu0  ;;  %v746_v63 = vpop.f32.mrb[5].mxu1 }
  0xff   :  { %v1031_v0 = vadd.f32 %v698_v62, %v697_v60  ;;  %v1033_v1 = vadd.f32 %v746_v63, %v745_v61  ;;  %v700_v2 = vpop.f32.mrb[6].mxu0  ;;  %v748_v3 = vpop.f32.mrb[6].mxu1 }
 0x100   :  { %v701_v4 = vpop.f32.mrb[7].mxu0  ;;  %v749_v5 = vpop.f32.mrb[7].mxu1 }
 0x101   :  { %v1035_v6 = vadd.f32 %v701_v4, %v700_v2  ;;  %v1037_v7 = vadd.f32 %v749_v5, %v748_v3 }
 0x105   :  { %v703_v8 = vpop.f32.mrb[8].mxu0  ;;  %v751_v9 = vpop.f32.mrb[8].mxu1 }
 0x106   :  { %v704_v10 = vpop.f32.mrb[9].mxu0  ;;  %v752_v11 = vpop.f32.mrb[9].mxu1 }
 0x107   :  { %v1039_v12 = vadd.f32 %v704_v10, %v703_v8  ;;  %v1041_v13 = vadd.f32 %v752_v11, %v751_v9  ;;  %v706_v14 = vpop.f32.mrb[10].mxu0  ;;  %v754_v15 = vpop.f32.mrb[10].mxu1 }
 0x108   :  { %v707_v16 = vpop.f32.mrb[11].mxu0  ;;  %v755_v17 = vpop.f32.mrb[11].mxu1 }
 0x109   :  { %v1043_v18 = vadd.f32 %v707_v16, %v706_v14  ;;  %v1045_v19 = vadd.f32 %v755_v17, %v754_v15 }
 0x10d   :  { %v709_v20 = vpop.f32.mrb[12].mxu0  ;;  %v757_v21 = vpop.f32.mrb[12].mxu1 }
 0x10e   :  { %v710_v22 = vpop.f32.mrb[13].mxu0  ;;  %v758_v23 = vpop.f32.mrb[13].mxu1 }
 0x10f   :  { %v1047_v24 = vadd.f32 %v710_v22, %v709_v20  ;;  %v1049_v25 = vadd.f32 %v758_v23, %v757_v21  ;;  %v712_v26 = vpop.f32.mrb[14].mxu0  ;;  %v760_v27 = vpop.f32.mrb[14].mxu1 }
 0x110   :  { %v713_v28 = vpop.f32.mrb[15].mxu0  ;;  %v761_v29 = vpop.f32.mrb[15].mxu1 }
 0x111   :  { %v1051_v30 = vadd.f32 %v713_v28, %v712_v26  ;;  %v1053_v31 = vadd.f32 %v761_v29, %v760_v27 }
 0x115   :  { %v715_v32 = vpop.f32.mrb[16].mxu0  ;;  %v763_v33 = vpop.f32.mrb[16].mxu1 }
 0x116   :  { %v716_v34 = vpop.f32.mrb[17].mxu0  ;;  %v764_v35 = vpop.f32.mrb[17].mxu1 }
 0x117   :  { %v717_v36 = vadd.f32 %v716_v34, %v715_v32  ;;  %v765_v37 = vadd.f32 %v764_v35, %v763_v33  ;;  %v718_v38 = vpop.f32.mrb[18].mxu0  ;;  %v766_v39 = vpop.f32.mrb[18].mxu1 }
 0x118   :  { %v719_v40 = vpop.f32.mrb[19].mxu0  ;;  %v767_v41 = vpop.f32.mrb[19].mxu1 }
 0x119   :  { %v496_v42 = vmax.f32 %v693_v52, %v717_v36  ;;  %v504_v43 = vmax.f32 %v741_v53, %v765_v37  ;;  %v720_v44 = vadd.f32 %v719_v40, %v718_v38  ;;  %v768_v45 = vadd.f32 %v767_v41, %v766_v39 }
 0x11b   :  { %v512_v47 = vmax.f32 %v496_v42, %v504_v43  ;;  %v497_v48 = vmax.f32 %v696_v58, %v720_v44  ;;  %v505_v49 = vmax.f32 %v744_v59, %v768_v45 }
 0x11d   :  { %v527_v50 = vadd.f32 %v1058_v46, %v512_v47  ;;  %v513_v51 = vmax.f32 %v497_v48, %v505_v49  ;;  %v721_v54 = vpop.f32.mrb[20].mxu0  ;;  %v769_v55 = vpop.f32.mrb[20].mxu1 }
 0x11e   :  { %v722_v56 = vpop.f32.mrb[21].mxu0  ;;  %v770_v57 = vpop.f32.mrb[21].mxu1 }
 0x11f   :  { %v528_v52 = vadd.f32 %v1058_v46, %v513_v51  ;;  %v723_v53 = vadd.f32 %v722_v56, %v721_v54  ;;  %v771_v60 = vadd.f32 %v770_v57, %v769_v55  ;;  %v724_v61 = vpop.f32.mrb[22].mxu0  ;;  %v772_v62 = vpop.f32.mrb[22].mxu1  ;;  %v535_v63 = vmax.f32 %v527_v50, 0.0 }
 0x120   :  { %v725_v2 = vpop.f32.mrb[23].mxu0  ;;  %v773_v3 = vpop.f32.mrb[23].mxu1 }
 0x121   :  { %v536_v4 = vmax.f32 %v528_v52, 0.0  ;;  %v498_v58 = vmax.f32 %v1031_v0, %v723_v53  ;;  %v506_v59 = vmax.f32 %v1033_v1, %v771_v60  ;;  %v726_v5 = vadd.f32 %v725_v2, %v724_v61 }
 0x122   :  { %v774_v8 = vadd.f32 %v773_v3, %v772_v62 }
 0x123   :  { %v655_v9 = vpack.c.bf16 %v536_v4, %v535_v63  ;;  %v514_v10 = vmax.f32 %v498_v58, %v506_v59  ;;  %v499_v11 = vmax.f32 %v1035_v6, %v726_v5 }
 0x124   :  { %v507_v14 = vmax.f32 %v1037_v7, %v774_v8 }
 0x125   :  { %656 = vst [vmem:[%s1095_s3] sm:$0xff] %v655_v9   ;;  %v727_v15 = vpop.f32.mrb[24].mxu0  ;;  %v775_v16 = vpop.f32.mrb[24].mxu1  ;;  %v529_v17 = vadd.f32 %v1058_v46, %v514_v10 }
 0x126   :  { %v515_v20 = vmax.f32 %v499_v11, %v507_v14  ;;  %v728_v0 = vpop.f32.mrb[25].mxu0  ;;  %v776_v21 = vpop.f32.mrb[25].mxu1 }
 0x127   :  { %v729_v1 = vadd.f32 %v728_v0, %v727_v15  ;;  %v777_v22 = vadd.f32 %v776_v21, %v775_v16  ;;  %v730_v23 = vpop.f32.mrb[26].mxu0  ;;  %v778_v26 = vpop.f32.mrb[26].mxu1  ;;  %v537_v34 = vmax.f32 %v529_v17, 0.0 }
 0x128   :  { %v530_v27 = vadd.f32 %v1058_v46, %v515_v20  ;;  %v731_v6 = vpop.f32.mrb[27].mxu0  ;;  %v779_v28 = vpop.f32.mrb[27].mxu1 }
 0x129   :  { %v500_v7 = vmax.f32 %v1039_v12, %v729_v1  ;;  %v508_v29 = vmax.f32 %v1041_v13, %v777_v22  ;;  %v732_v32 = vadd.f32 %v731_v6, %v730_v23  ;;  %v780_v33 = vadd.f32 %v779_v28, %v778_v26 }
 0x12a   :  { %v538_v35 = vmax.f32 %v530_v27, 0.0 }
 0x12b   :  { %v516_v36 = vmax.f32 %v500_v7, %v508_v29  ;;  %v501_v37 = vmax.f32 %v1043_v18, %v732_v32  ;;  %v509_v38 = vmax.f32 %v1045_v19, %v780_v33 }
 0x12c   :  { %v660_v39 = vpack.c.bf16 %v538_v35, %v537_v34 }
 0x12d   :  { %v531_v40 = vadd.f32 %v1058_v46, %v516_v36  ;;  %v517_v41 = vmax.f32 %v501_v37, %v509_v38  ;;  %v733_v42 = vpop.f32.mrb[28].mxu0  ;;  %v781_v43 = vpop.f32.mrb[28].mxu1 }
 0x12e   :  { %672 = vst [vmem:[%s1095_s3 + $0x8] sm:$0xff] %v660_v39   ;;  %v734_v12 = vpop.f32.mrb[29].mxu0  ;;  %v782_v13 = vpop.f32.mrb[29].mxu1 }
 0x12f   :  { %v532_v44 = vadd.f32 %v1058_v46, %v517_v41  ;;  %v735_v45 = vadd.f32 %v734_v12, %v733_v42  ;;  %v783_v47 = vadd.f32 %v782_v13, %v781_v43  ;;  %v736_v48 = vpop.f32.mrb[30].mxu0  ;;  %v784_v18 = vpop.f32.mrb[30].mxu1  ;;  %v539_v49 = vmax.f32 %v531_v40, 0.0 }
 0x130   :  { %v737_v19 = vpop.f32.mrb[31].mxu0  ;;  %v785_v50 = vpop.f32.mrb[31].mxu1 }
 0x131   :  { %v540_v51 = vmax.f32 %v532_v44, 0.0  ;;  %v502_v54 = vmax.f32 %v1047_v24, %v735_v45  ;;  %v510_v55 = vmax.f32 %v1049_v25, %v783_v47  ;;  %v738_v56 = vadd.f32 %v737_v19, %v736_v48 }
 0x132   :  { %v786_v57 = vadd.f32 %v785_v50, %v784_v18 }
 0x133   :  { %v665_v52 = vpack.c.bf16 %v540_v51, %v539_v49  ;;  %v518_v53 = vmax.f32 %v502_v54, %v510_v55  ;;  %v503_v60 = vmax.f32 %v1051_v30, %v738_v56 }
 0x134   :  { %v511_v61 = vmax.f32 %v1053_v31, %v786_v57 }
 0x135   :  { %673 = vst [vmem:[%s1095_s3 + $0x10] sm:$0xff] %v665_v52   ;;  %v533_v62 = vadd.f32 %v1058_v46, %v518_v53 }
 0x136   :  { %v519_v63 = vmax.f32 %v503_v60, %v511_v61 }
 0x137   :  { %v541_v24 = vmax.f32 %v533_v62, 0.0 }
 0x138   :  { %v534_v2 = vadd.f32 %v1058_v46, %v519_v63 }
 0x13a   :  { %v542_v3 = vmax.f32 %v534_v2, 0.0 }
 0x13c   :  { %v670_v25 = vpack.c.bf16 %v542_v3, %v541_v24 }
 0x13e   :  { %674 = vst [vmem:[%s1095_s3 + $0x18] sm:$0xff] %v670_v25  }

// kernel: lenet_forward.5
= control target key start
LH: loop header
LB: loop body
LE: loop exit
PB: predicated region body
PF: predicated region fallthrough
CT: control target
= control target key end

     0   :  { %v828_v39 = vmov 0.0   ;;  %vm829_vm0 = vmmov 0   ;;  %s1050_s1 = inlined_call_operand.vmem [shape: bf16[512,128], index: 1, kind: input, shape index: {}]   ;;  %s1051_s0 = inlined_call_operand.vmem [shape: bf16[8,512], index: 0, kind: input, shape index: {}]   ;;  %s1052_s3 = inlined_call_operand.vmem [shape: bf16[128,128], index: 3, kind: input, shape index: {}]   ;;  %s1053_s5 = inlined_call_operand.vmem [shape: bf16[128,128], index: 5, kind: input, shape index: {}]   ;;  %s1054_s2 = inlined_call_operand.vmem [shape: f32[1,128], index: 2, kind: input, shape index: {}]   ;;  %s1055_s4 = inlined_call_operand.vmem [shape: f32[1,128], index: 4, kind: input, shape index: {}]   ;;  %s1056_s6 = inlined_call_operand.vmem [shape: f32[1,128], index: 6, kind: input, shape index: {}]   ;;  %s1057_s7 = inlined_call_operand.vmem [shape: f32[8,128], index: 7, kind: output, shape index: {}]  }
   0x1   :  { %v776_v0 = vld [vmem:[%s1050_s1 + $0x40] sm:$0xff]   ;;  %v780_v4 = vld [vmem:[%s1050_s1 + $0x48] sm:$0xff]   ;;  %v784_v8 = vld [vmem:[%s1050_s1 + $0x50] sm:$0xff]  }
   0x2   :  { %v777_v1 = vld [vmem:[%s1050_s1 + $0xc0] sm:$0xff]   ;;  %672 = vmatprep.subr.bf16.mxu0 %v776_v0  ;;  %v781_v5 = vld [vmem:[%s1050_s1 + $0xc8] sm:$0xff]   ;;  %v785_v9 = vld [vmem:[%s1050_s1 + $0xd0] sm:$0xff]  }
   0x3   :  { %v778_v2 = vld [vmem:[%s1050_s1] sm:$0xff]   ;;  %694 = vmatprep.subr.bf16.mxu1 %v777_v1  ;;  %v782_v6 = vld [vmem:[%s1050_s1 + $0x8] sm:$0xff]   ;;  %v786_v10 = vld [vmem:[%s1050_s1 + $0x10] sm:$0xff]  }
   0x4   :  { %v779_v3 = vld [vmem:[%s1050_s1 + $0x80] sm:$0xff]   ;;  %673 = vmatpush3.bf16.msra.mxu0 %v778_v2  ;;  %v783_v7 = vld [vmem:[%s1050_s1 + $0x88] sm:$0xff]   ;;  %v787_v11 = vld [vmem:[%s1050_s1 + $0x90] sm:$0xff]  }
   0x5   :  { %695 = vmatpush3.bf16.msra.mxu1 %v779_v3  ;;  %674 = vmatprep.subr.bf16.mxu0 %v780_v4  ;;  %v788_v12 = vld [vmem:[%s1050_s1 + $0x58] sm:$0xff]   ;;  %v792_v16 = vld [vmem:[%s1050_s1 + $0x60] sm:$0xff]   ;;  %v796_v20 = vld [vmem:[%s1050_s1 + $0x68] sm:$0xff]  }
   0x6   :  { %696 = vmatprep.subr.bf16.mxu1 %v781_v5  ;;  %v789_v13 = vld [vmem:[%s1050_s1 + $0xd8] sm:$0xff]   ;;  %v793_v17 = vld [vmem:[%s1050_s1 + $0xe0] sm:$0xff]   ;;  %v797_v21 = vld [vmem:[%s1050_s1 + $0xe8] sm:$0xff]  }
   0x7   :  { %v790_v14 = vld [vmem:[%s1050_s1 + $0x18] sm:$0xff]   ;;  %v794_v18 = vld [vmem:[%s1050_s1 + $0x20] sm:$0xff]   ;;  %v798_v22 = vld [vmem:[%s1050_s1 + $0x28] sm:$0xff]  }
   0x8   :  { %675 = vmatpush3.bf16.msra.mxu0 %v782_v6  ;;  %v791_v15 = vld [vmem:[%s1050_s1 + $0x98] sm:$0xff]   ;;  %v795_v19 = vld [vmem:[%s1050_s1 + $0xa0] sm:$0xff]   ;;  %v799_v23 = vld [vmem:[%s1050_s1 + $0xa8] sm:$0xff]  }
   0x9   :  { %697 = vmatpush3.bf16.msra.mxu1 %v783_v7  ;;  %676 = vmatprep.subr.bf16.mxu0 %v784_v8  ;;  %v800_v24 = vld [vmem:[%s1050_s1 + $0x70] sm:$0xff]   ;;  %v804_v28 = vld [vmem:[%s1050_s1 + $0x78] sm:$0xff]   ;;  %v27_v32 = vld [vmem:[%s1051_s0] sm:$0xff] }
   0xa   :  { %698 = vmatprep.subr.bf16.mxu1 %v785_v9  ;;  %v801_v25 = vld [vmem:[%s1050_s1 + $0xf0] sm:$0xff]   ;;  %v805_v29 = vld [vmem:[%s1050_s1 + $0xf8] sm:$0xff]   ;;  %v28_v33 = vld [vmem:[%s1051_s0 + $0x8] sm:$0xff]  ;;  %v618_v34 = vcombine.low %v27_v32, %v27_v32  ;;  %v619_v35 = vcombine.high %v27_v32, %v27_v32 }
   0xb   :  { %v802_v26 = vld [vmem:[%s1050_s1 + $0x30] sm:$0xff]   ;;  %v806_v30 = vld [vmem:[%s1050_s1 + $0x38] sm:$0xff]   ;;  %v620_v36 = vcombine.low %v28_v33, %v28_v33  ;;  %v621_v37 = vcombine.high %v28_v33, %v28_v33  ;;  %v812_v38 = vld [vmem:[%s1052_s3] sm:$0xff]  }
   0xc   :  { %677 = vmatpush3.bf16.msra.mxu0 %v786_v10  ;;  %v803_v27 = vld [vmem:[%s1050_s1 + $0xb0] sm:$0xff]   ;;  %v807_v31 = vld [vmem:[%s1050_s1 + $0xb8] sm:$0xff]   ;;  %338 = vmatprep.mubr.bf16.mxu0 %v619_v35  ;;  %v813_v40 = vld [vmem:[%s1052_s3 + $0x8] sm:$0xff]  }
   0xd   :  { %699 = vmatpush3.bf16.msra.mxu1 %v787_v11  ;;  %678 = vmatprep.subr.bf16.mxu0 %v788_v12  ;;  %v814_v41 = vld [vmem:[%s1052_s3 + $0x10] sm:$0xff]   ;;  %v815_v42 = vld [vmem:[%s1052_s3 + $0x18] sm:$0xff]   ;;  %v816_v43 = vld [vmem:[%s1052_s3 + $0x20] sm:$0xff]  }
   0xe   :  { %700 = vmatprep.subr.bf16.mxu1 %v789_v13  ;;  %378 = vmatprep.mubr.bf16.mxu1 %v621_v37  ;;  %v817_v44 = vld [vmem:[%s1052_s3 + $0x28] sm:$0xff]   ;;  %v818_v45 = vld [vmem:[%s1052_s3 + $0x30] sm:$0xff]   ;;  %v819_v46 = vld [vmem:[%s1052_s3 + $0x38] sm:$0xff]  }
   0xf   :  { %v820_v47 = vld [vmem:[%s1053_s5] sm:$0xff]   ;;  %v821_v48 = vld [vmem:[%s1053_s5 + $0x8] sm:$0xff]   ;;  %v822_v49 = vld [vmem:[%s1053_s5 + $0x10] sm:$0xff]  }
  0x10   :  { %679 = vmatpush3.bf16.msra.mxu0 %v790_v14  ;;  %v823_v50 = vld [vmem:[%s1053_s5 + $0x18] sm:$0xff]   ;;  %v824_v51 = vld [vmem:[%s1053_s5 + $0x20] sm:$0xff]   ;;  %v825_v52 = vld [vmem:[%s1053_s5 + $0x28] sm:$0xff]  }
  0x11   :  { %701 = vmatpush3.bf16.msra.mxu1 %v791_v15  ;;  %680 = vmatprep.subr.bf16.mxu0 %v792_v16  ;;  %v617_v55 = vld [vmem:[%s1054_s2] ss:$0 sm:$0xff]  ;;  %v826_v4 = vld [vmem:[%s1053_s5 + $0x30] sm:$0xff]   ;;  %v827_v5 = vld [vmem:[%s1053_s5 + $0x38] sm:$0xff]  }
  0x12   :  { %702 = vmatprep.subr.bf16.mxu1 %v793_v17  ;;  %v654_v6 = vld [vmem:[%s1055_s4] ss:$0 sm:$0xff] }
  0x13   :  { %v663_v14 = vld [vmem:[%s1056_s6] ss:$0 sm:$0xff] }
  0x14   :  { %681 = vmatpush3.bf16.msra.mxu0 %v794_v18 }
  0x15   :  { %703 = vmatpush3.bf16.msra.mxu1 %v795_v19  ;;  %682 = vmatprep.subr.bf16.mxu0 %v796_v20 }
  0x16   :  { %704 = vmatprep.subr.bf16.mxu1 %v797_v21 }
  0x18   :  { %683 = vmatpush3.bf16.msra.mxu0 %v798_v22 }
  0x19   :  { %705 = vmatpush3.bf16.msra.mxu1 %v799_v23  ;;  %684 = vmatprep.subr.bf16.mxu0 %v800_v24 }
  0x1a   :  { %706 = vmatprep.subr.bf16.mxu1 %v801_v25 }
  0x1c   :  { %685 = vmatpush3.bf16.msra.mxu0 %v802_v26 }
  0x1d   :  { %707 = vmatpush3.bf16.msra.mxu1 %v803_v27  ;;  %686 = vmatprep.subr.bf16.mxu0 %v804_v28 }
  0x1e   :  { %708 = vmatprep.subr.bf16.mxu1 %v805_v29 }
  0x20   :  { %687 = vmatpush3.bf16.msra.mxu0 %v806_v30 }
  0x21   :  { %709 = vmatpush3.bf16.msra.mxu1 %v807_v31  ;;  %734 = vmatprep.subr.bf16.mxu0 %v828_v39 }
  0x22   :  { %754 = vmatprep.subr.bf16.mxu1 %v828_v39 }
  0x23   :  { %339 = vmatmul.mubr.bf16.vlgmr.msra.gmra.mrb[0].mxu0 %v618_v34 }
  0x24   :  { %379 = vmatmul.mubr.bf16.vlgmr.msra.gmra.mrb[0].mxu1 %v620_v36  ;;  %735 = vmatpush3.bf16.msra.mxu0 %v812_v38 }
  0x25   :  { %736 = vmatprep.subr.bf16.mxu0 %v828_v39  ;;  %750 = vmatprep.mubr.msk.bf16.mxu0 %vm829_vm0, %v828_v39 }
  0x26   :  { %770 = vmatprep.mubr.msk.bf16.mxu1 %vm829_vm0, %v828_v39  ;;  %755 = vmatpush3.bf16.msra.mxu1 %v820_v47 }
  0x27   :  { %756 = vmatprep.subr.bf16.mxu1 %v828_v39 }
  0x28   :  { %737 = vmatpush3.bf16.msra.mxu0 %v813_v40 }
  0x29   :  { %738 = vmatprep.subr.bf16.mxu0 %v828_v39 }
  0x2a   :  { %757 = vmatpush3.bf16.msra.mxu1 %v821_v48 }
  0x2b   :  { %758 = vmatprep.subr.bf16.mxu1 %v828_v39 }
  0x2c   :  { %739 = vmatpush3.bf16.msra.mxu0 %v814_v41 }
  0x2d   :  { %740 = vmatprep.subr.bf16.mxu0 %v828_v39 }
  0x2e   :  { %759 = vmatpush3.bf16.msra.mxu1 %v822_v49 }
  0x2f   :  { %760 = vmatprep.subr.bf16.mxu1 %v828_v39 }
  0x30   :  { %741 = vmatpush3.bf16.msra.mxu0 %v815_v42 }
  0x31   :  { %742 = vmatprep.subr.bf16.mxu0 %v828_v39 }
  0x32   :  { %761 = vmatpush3.bf16.msra.mxu1 %v823_v50 }
  0x33   :  { %762 = vmatprep.subr.bf16.mxu1 %v828_v39 }
  0x34   :  { %743 = vmatpush3.bf16.msra.mxu0 %v816_v43 }
  0x35   :  { %744 = vmatprep.subr.bf16.mxu0 %v828_v39 }
  0x36   :  { %763 = vmatpush3.bf16.msra.mxu1 %v824_v51 }
  0x37   :  { %764 = vmatprep.subr.bf16.mxu1 %v828_v39 }
  0x38   :  { %745 = vmatpush3.bf16.msra.mxu0 %v817_v44 }
  0x39   :  { %746 = vmatprep.subr.bf16.mxu0 %v828_v39 }
  0x3a   :  { %765 = vmatpush3.bf16.msra.mxu1 %v825_v52 }
  0x3b   :  { %766 = vmatprep.subr.bf16.mxu1 %v828_v39 }
  0x3c   :  { %747 = vmatpush3.bf16.msra.mxu0 %v818_v45 }
  0x3d   :  { %748 = vmatprep.subr.bf16.mxu0 %v828_v39 }
  0x3e   :  { %767 = vmatpush3.bf16.msra.mxu1 %v826_v4 }
  0x3f   :  { %768 = vmatprep.subr.bf16.mxu1 %v828_v39 }
  0x40   :  { %749 = vmatpush3.bf16.msra.mxu0 %v819_v46 }
  0x42   :  { %769 = vmatpush3.bf16.msra.mxu1 %v827_v5 }
  0xf6   :  { %v688_v53 = vpop.f32.mrb[0].mxu0 }
  0xf7   :  { %v710_v54 = vpop.f32.mrb[0].mxu1  ;;  %v689_v56 = vpop.f32.mrb[1].mxu0 }
  0xf8   :  { %v711_v57 = vpop.f32.mrb[1].mxu1  ;;  %v690_v58 = vadd.f32 %v689_v56, %v688_v53  ;;  %v691_v60 = vpop.f32.mrb[2].mxu0 }
  0xf9   :  { %v712_v59 = vadd.f32 %v711_v57, %v710_v54  ;;  %v713_v61 = vpop.f32.mrb[2].mxu1  ;;  %v692_v62 = vpop.f32.mrb[3].mxu0 }
  0xfa   :  { %v714_v63 = vpop.f32.mrb[3].mxu1  ;;  %v341_v0 = vadd.f32 %v690_v58, %v617_v55 }
  0xfc   :  { %v381_v1 = vadd.f32 %v712_v59, %v341_v0 }
  0xfe   :  { %v386_v2 = vmax.f32 %v381_v1, 0.0 }
 0x100   :  { %v387_v3 = vpack.c.bf16 %v386_v2, %v386_v2 }
 0x102   :  { %751 = vmatmul.mubr.bf16.vlgmr.msra.gmra.mrb[4].mxu0 %v387_v3 }
 0x1d5   :  { %v493_v7 = vpop.f32.mrb[4].mxu0 }
 0x1d6   :  { %v494_v8 = vadd.f32 %v654_v6, %v493_v7  ;;  %v752_v9 = vpop.f32.mrb[5].mxu0 }
 0x1d7   :  { %v496_v10 = vpop.f32.mrb[6].mxu0 }
 0x1d8   :  { %v499_v11 = vmax.f32 %v494_v8, 0.0  ;;  %v753_v12 = vpop.f32.mrb[7].mxu0 }
 0x1da   :  { %v500_v13 = vpack.c.bf16 %v499_v11, %v499_v11 }
 0x1dc   :  { %771 = vmatmul.mubr.bf16.vlgmr.msra.gmra.mrb[4].mxu1 %v500_v13 }
 0x2af   :  { %v606_v15 = vpop.f32.mrb[4].mxu1 }
 0x2b0   :  { %v607_v16 = vadd.f32 %v663_v14, %v606_v15  ;;  %v772_v17 = vpop.f32.mrb[5].mxu1 }
 0x2b1   :  { %v609_v18 = vpop.f32.mrb[6].mxu1 }
 0x2b2   :  { %612 = vst [vmem:[%s1057_s7] sm:$0xff] %v607_v16  ;;  %v773_v19 = vpop.f32.mrb[7].mxu1 }

</bundles_post_ra>
